<compile_context>
chip_gen: v7x
topology: tpu7x:2x2x1
jax: 0.10.0
libtpu: 0.0.40
codegen_flags: <defaults>
</compile_context>

<pallas_src>
import random

import jax
import jax.numpy as jnp
from jax.experimental import pallas as pl
from jax.experimental.pallas import tpu as pltpu


# --------------------------- shared LSTM-cell math ---------------------------
def _lstm_step(x, h, c, w_ref, b_ref):
    """One LSTM cell update.  x:(B,E) f32, h/c:(B,H) f32, w_ref:(E+H,4H) bf16, b_ref:(1,4H) f32."""
    xh = jnp.concatenate([x.astype(jnp.bfloat16), h.astype(jnp.bfloat16)], axis=-1)
    gates = (jnp.dot(xh, w_ref[...], preferred_element_type=jnp.float32)
             + b_ref[...])                               # (B, 4H), PyTorch gate order i,f,g,o
    H = h.shape[-1]
    i = jax.nn.sigmoid(gates[:, 0 * H:1 * H])
    f = jax.nn.sigmoid(gates[:, 1 * H:2 * H])
    g = jnp.tanh(gates[:, 2 * H:3 * H])
    o = jax.nn.sigmoid(gates[:, 3 * H:4 * H])
    c_new = f * c + i * g
    h_new = o * jnp.tanh(c_new)
    return h_new, c_new


# ------------------------------ encoder kernel -------------------------------
def _encoder_kernel(x_ref, w_ref, b_ref, enc_out_ref, hn_ref, cn_ref, h_scr, c_scr):
    s = pl.program_id(0)

    @pl.when(s == 0)
    def _():
        h_scr[...] = jnp.zeros_like(h_scr)
        c_scr[...] = jnp.zeros_like(c_scr)

    h_new, c_new = _lstm_step(x_ref[...], h_scr[...], c_scr[...], w_ref, b_ref)
    h_scr[...] = h_new
    c_scr[...] = c_new
    enc_out_ref[...] = h_new.astype(enc_out_ref.dtype)   # per-step encoder output (B, H)
    hn_ref[...] = h_new                                  # constant block index: last write
    cn_ref[...] = c_new                                  # survives as the final state


def run_encoder(source_tm, enc_w, enc_b):
    S, B, E = source_tm.shape
    H = enc_w.shape[1] // 4
    grid_spec = pltpu.PrefetchScalarGridSpec(
        num_scalar_prefetch=0,
        grid=(S,),
        in_specs=[
            pl.BlockSpec((None, B, E), lambda s: (s, 0, 0)),      # source[:, s, :] (time-major)
            pl.BlockSpec((E + H, 4 * H), lambda s: (0, 0)),       # fused [Wih;Whh], loaded once
            pl.BlockSpec((1, 4 * H), lambda s: (0, 0)),           # bias, loaded once
        ],
        out_specs=(
            pl.BlockSpec((None, B, H), lambda s: (s, 0, 0)),      # enc_outputs (time-major)
            pl.BlockSpec((B, H), lambda s: (0, 0)),               # final hidden
            pl.BlockSpec((B, H), lambda s: (0, 0)),               # final cell
        ),
        scratch_shapes=[pltpu.VMEM((B, H), jnp.float32),
                        pltpu.VMEM((B, H), jnp.float32)],
    )
    return pl.pallas_call(
        _encoder_kernel,
        grid_spec=grid_spec,
        out_shape=(jax.ShapeDtypeStruct((S, B, H), jnp.bfloat16),
                   jax.ShapeDtypeStruct((B, H), jnp.float32),
                   jax.ShapeDtypeStruct((B, H), jnp.float32)),
        compiler_params=pltpu.CompilerParams(dimension_semantics=("arbitrary",)),
    )(source_tm, enc_w, enc_b)


# ------------------------------ decoder kernel -------------------------------
def _decoder_kernel(use_tgt_ref, tgt_ref, enc_ref, h0_ref, c0_ref,
                    w_ref, b_ref, fcw_ref, fcb_ref, m_ref,
                    out_ref, h_scr, c_scr, fb_scr):
    k = pl.program_id(0)

    @pl.when(k == 0)
    def _():
        h_scr[...] = h0_ref[...]
        c_scr[...] = c0_ref[...]
        fb_scr[...] = jnp.zeros_like(fb_scr)

    # Teacher forcing: ground-truth previous token vs previous logits @ M.
    # Exact arithmetic select (w is 0.0/1.0, fb_scr is initialized, all values finite).
    w_sel = (use_tgt_ref[k] > 0).astype(jnp.float32)
    x = w_sel * tgt_ref[...] + (1.0 - w_sel) * fb_scr[...]          # (B, E)

    h_new, c_new = _lstm_step(x, h_scr[...], c_scr[...], w_ref, b_ref)
    h_scr[...] = h_new
    c_scr[...] = c_new

    # Dot-product attention over encoder outputs, contracted on the MXU.
    enc = enc_ref[...]                                               # (B, S, H) bf16
    q3 = h_new.astype(jnp.bfloat16)[:, None, :]                      # (B, 1, H)
    scores = jnp.einsum('bqh,bsh->bqs', q3, enc,
                        preferred_element_type=jnp.float32)          # (B, 1, S)
    mx = jnp.max(scores, axis=-1, keepdims=True)
    e = jnp.exp(scores - mx)
    wts = e * pl.reciprocal(jnp.sum(e, axis=-1, keepdims=True), approx=True)
    ctx3 = jnp.einsum('bqs,bsh->bqh', wts.astype(jnp.bfloat16), enc,
                      preferred_element_type=jnp.float32)            # (B, 1, H)
    fused = jnp.sum(ctx3, axis=1) + h_new                            # attention_vect + output

    logits = (jnp.dot(fused.astype(jnp.bfloat16), fcw_ref[...],
                      preferred_element_type=jnp.float32)
              + fcb_ref[...])                                        # (B, V)
    out_ref[...] = logits

    # Feedback for the next step: x_{k+1} = logits @ M (bias-free).
    fb_scr[...] = jnp.dot(logits.astype(jnp.bfloat16), m_ref[...],
                          preferred_element_type=jnp.float32)


def run_decoder(use_target, target_tm, enc_outputs, h0, c0, dec_w, dec_b, fc_w, fc_b, M):
    T, B, E = target_tm.shape
    _, S, H = enc_outputs.shape
    V = fc_w.shape[1]
    grid_spec = pltpu.PrefetchScalarGridSpec(
        num_scalar_prefetch=1,                                       # teacher-forcing flags
        grid=(T - 1,),
        in_specs=[
            pl.BlockSpec((None, B, E), lambda k, ut: (k, 0, 0)),     # target[:, k, :]
            pl.BlockSpec((B, S, H), lambda k, ut: (0, 0, 0)),        # enc_outputs, VMEM-resident
            pl.BlockSpec((B, H), lambda k, ut: (0, 0)),              # h0
            pl.BlockSpec((B, H), lambda k, ut: (0, 0)),              # c0
            pl.BlockSpec((E + H, 4 * H), lambda k, ut: (0, 0)),      # fused decoder weights
            pl.BlockSpec((1, 4 * H), lambda k, ut: (0, 0)),          # decoder bias
            pl.BlockSpec((H, V), lambda k, ut: (0, 0)),              # fc_out weight
            pl.BlockSpec((1, V), lambda k, ut: (0, 0)),              # fc_out bias
            pl.BlockSpec((V, E), lambda k, ut: (0, 0)),              # FastText matrix M
        ],
        out_specs=pl.BlockSpec((None, B, V), lambda k, ut: (k, 0, 0)),
        scratch_shapes=[pltpu.VMEM((B, H), jnp.float32),             # h carry
                        pltpu.VMEM((B, H), jnp.float32),             # c carry
                        pltpu.VMEM((B, E), jnp.float32)],            # feedback (logits @ M)
    )
    return pl.pallas_call(
        _decoder_kernel,
        grid_spec=grid_spec,
        out_shape=jax.ShapeDtypeStruct((T - 1, B, V), jnp.float32),
        compiler_params=pltpu.CompilerParams(dimension_semantics=("arbitrary",)),
    )(use_target, target_tm, enc_outputs, h0, c0, dec_w, dec_b, fc_w, fc_b, M)


# ------------------------------ Seq2Seq forward ------------------------------
def seq2seq_forward(source, target, params, use_target):
    """source: (B,S,E)  target: (B,T,E)  ->  outputs: (B,T,V) (row t=0 stays zero)."""
    B, T, _ = target.shape
    V = params["fc_w"].shape[1]

    # Encoder: one fused Pallas call over all S steps.
    src_tm = jnp.transpose(source, (1, 0, 2))                        # (S, B, E)
    enc_tm, h_n, c_n = run_encoder(src_tm, params["enc_w"], params["enc_b"])
    enc_outputs = jnp.transpose(enc_tm, (1, 0, 2))                   # (B, S, H) bf16

    # Decoder: one fused Pallas call over all T-1 steps (LSTM + attention + fc + feedback).
    tgt_tm = jnp.transpose(target, (1, 0, 2))                        # (T, B, E)
    dec_tm = run_decoder(use_target, tgt_tm, enc_outputs, h_n, c_n,
                         params["dec_w"], params["dec_b"],
                         params["fc_w"], params["fc_b"], params["M"])
    dec_bm = jnp.transpose(dec_tm, (1, 0, 2))                        # (B, T-1, V)
    return jnp.concatenate([jnp.zeros((B, 1, V), jnp.float32), dec_bm], axis=1)


if __name__ == "__main__":
    B, S, T = 8, 8, 6        # batch, source length, target length (B=8 fills an f32 sublane group)
    E = 128                  # embedding dim (lane-aligned; encoder/decoder input, M columns)
    H = 128                  # hidden dim (lane-aligned -> gate slices are full 128-lane blocks)
    V = 256                  # output_dim (985671 in the original, shrunk; multiple of 128)

    key = jax.random.PRNGKey(0)
    ks = jax.random.split(key, 11)
    f32 = jnp.float32
    enc_wih = 0.1 * jax.random.normal(ks[0], (E, 4 * H), f32)
    enc_whh = 0.1 * jax.random.normal(ks[1], (H, 4 * H), f32)
    dec_wih = 0.1 * jax.random.normal(ks[3], (E, 4 * H), f32)
    dec_whh = 0.1 * jax.random.normal(ks[4], (H, 4 * H), f32)
    params = {
        # Input & recurrent weights concatenated -> one (B,E+H)x(E+H,4H) MXU matmul per step.
        "enc_w": jnp.concatenate([enc_wih, enc_whh], axis=0).astype(jnp.bfloat16),
        "enc_b": 0.1 * jax.random.normal(ks[2], (1, 4 * H), f32),
        "dec_w": jnp.concatenate([dec_wih, dec_whh], axis=0).astype(jnp.bfloat16),
        "dec_b": 0.1 * jax.random.normal(ks[5], (1, 4 * H), f32),
        "fc_w":  (0.1 * jax.random.normal(ks[6], (H, V), f32)).astype(jnp.bfloat16),
        "fc_b":  0.1 * jax.random.normal(ks[7], (1, V), f32),
        # TODO(synk): FastText('es') vectors cannot be loaded in-script; deterministic stand-in
        # with the same structure (4 zero rows appended, as in __init__).
        "M": jnp.concatenate(
            [0.1 * jax.random.normal(ks[8], (V - 4, E), f32),
             jnp.zeros((4, E), f32)], axis=0).astype(jnp.bfloat16),
    }

    source = jax.random.normal(ks[9], (B, S, E), f32)
    target = jax.random.normal(ks[10], (B, T, E), f32)

    # Deterministic replacement for `random.random() < teacher_forcing_ratio`.
    # tf_seq[j] is the decision made at decoder step t=j+1; it selects the *next* step's input,
    # so grid step k>=1 consumes tf_seq[k-1] and grid step 0 always uses target[:, 0, :].
    rng = random.Random(0)
    tf_seq = [rng.random() < 0.5 for _ in range(T - 1)]
    use_target = jnp.array([1] + [int(b) for b in tf_seq[:T - 2]], dtype=jnp.int32)

    fwd = jax.jit(seq2seq_forward)
    out = fwd(source, target, params, use_target)
    jax.block_until_ready(out)
    assert out.shape == (B, T, V)
    print("KERNEL_OK")
</pallas_src>

<mosaic_0001>
module attributes {stable_mosaic.version = 11 : i64} {
  func.func @_encoder_kernel(%arg0: i32, %arg1: memref<1x8x128xf32, #tpu.memory_space<vmem>>, %arg2: memref<256x512xbf16, #tpu.memory_space<vmem>>, %arg3: memref<1x512xf32, #tpu.memory_space<vmem>>, %arg4: memref<1x8x128xbf16, #tpu.memory_space<vmem>>, %arg5: memref<8x128xf32, #tpu.memory_space<vmem>>, %arg6: memref<8x128xf32, #tpu.memory_space<vmem>>, %arg7: memref<8x128xf32, #tpu.memory_space<vmem>>, %arg8: memref<8x128xf32, #tpu.memory_space<vmem>>) attributes {dimension_semantics = [#tpu.dimension_semantics<arbitrary>], iteration_bounds = array<i64: 8>, scalar_prefetch = 0 : i64, scratch_operands = 2 : i64, tpu.core_type = #tpu.core_type<tc>, window_params = [{transform_indices = @transform_0, window_bounds = array<i64: 1, 8, 128>}, {pipeline_mode = #tpu.pipeline_mode<synchronous>, transform_indices = @transform_1, window_bounds = array<i64: 256, 512>}, {pipeline_mode = #tpu.pipeline_mode<synchronous>, transform_indices = @transform_2, window_bounds = array<i64: 1, 512>}, {transform_indices = @transform_3, window_bounds = array<i64: 1, 8, 128>}, {pipeline_mode = #tpu.pipeline_mode<synchronous>, transform_indices = @transform_4, window_bounds = array<i64: 8, 128>}, {pipeline_mode = #tpu.pipeline_mode<synchronous>, transform_indices = @transform_5, window_bounds = array<i64: 8, 128>}]} {
    %c0_i32 = arith.constant 0 : i32
    %0 = arith.cmpi eq, %arg0, %c0_i32 : i32
    %1 = arith.extui %0 : i1 to i32
    %c0_i32_0 = arith.constant 0 : i32
    %2 = arith.cmpi ne, %1, %c0_i32_0 : i32
    scf.if %2 {
      %cst_25 = arith.constant 0.000000e+00 : f32
      %48 = vector.broadcast %cst_25 : f32 to vector<8x128xf32>
      %c0_26 = arith.constant 0 : index
      %c0_27 = arith.constant 0 : index
      %49 = vector.load %arg7[%c0_26, %c0_27] : memref<8x128xf32, #tpu.memory_space<vmem>>, vector<8x128xf32>
      tpu.vector_store %arg7[%c0_26, %c0_27], %48 {strides = array<i32>} : memref<8x128xf32, #tpu.memory_space<vmem>>, vector<8x128xf32>,
      %cst_28 = arith.constant 0.000000e+00 : f32
      %50 = vector.broadcast %cst_28 : f32 to vector<8x128xf32>
      %c0_29 = arith.constant 0 : index
      %c0_30 = arith.constant 0 : index
      %51 = vector.load %arg8[%c0_29, %c0_30] : memref<8x128xf32, #tpu.memory_space<vmem>>, vector<8x128xf32>
      tpu.vector_store %arg8[%c0_29, %c0_30], %50 {strides = array<i32>} : memref<8x128xf32, #tpu.memory_space<vmem>>, vector<8x128xf32>,
    } else {
    }
    %c0 = arith.constant 0 : index
    %c0_1 = arith.constant 0 : index
    %c0_2 = arith.constant 0 : index
    %3 = vector.load %arg1[%c0, %c0_1, %c0_2] : memref<1x8x128xf32, #tpu.memory_space<vmem>>, vector<1x8x128xf32>
    %4 = vector.shape_cast %3 : vector<1x8x128xf32> to vector<8x128xf32>
    %c0_3 = arith.constant 0 : index
    %c0_4 = arith.constant 0 : index
    %5 = vector.load %arg7[%c0_3, %c0_4] : memref<8x128xf32, #tpu.memory_space<vmem>>, vector<8x128xf32>
    %c0_5 = arith.constant 0 : index
    %c0_6 = arith.constant 0 : index
    %6 = vector.load %arg8[%c0_5, %c0_6] : memref<8x128xf32, #tpu.memory_space<vmem>>, vector<8x128xf32>
    %7 = arith.truncf %4 : vector<8x128xf32> to vector<8x128xbf16>
    %8 = arith.truncf %5 : vector<8x128xf32> to vector<8x128xbf16>
    %9 = tpu.concatenate %7, %8 in 1 : vector<8x128xbf16>, vector<8x128xbf16> -> vector<8x256xbf16>
    %c0_7 = arith.constant 0 : index
    %c0_8 = arith.constant 0 : index
    %10 = vector.load %arg2[%c0_7, %c0_8] : memref<256x512xbf16, #tpu.memory_space<vmem>>, vector<256x512xbf16>
    %cst = arith.constant dense<0.000000e+00> : vector<8x512xf32>
    %11 = tpu.matmul %9, %10, %cst {dimension_numbers = #tpu.dot_dimension_numbers<[1], [0], [0], [1], [0, 0, 1, 1], [], []>} : vector<8x256xbf16>, vector<256x512xbf16>, vector<8x512xf32> -> vector<8x512xf32>
    %c0_9 = arith.constant 0 : index
    %c0_10 = arith.constant 0 : index
    %12 = vector.load %arg3[%c0_9, %c0_10] : memref<1x512xf32, #tpu.memory_space<vmem>>, vector<1x512xf32>
    %13 = vector.broadcast %12 : vector<1x512xf32> to vector<8x512xf32>
    %14 = arith.addf %11, %13 : vector<8x512xf32>
    %15 = vector.extract_strided_slice %14 {offsets = [0, 0], sizes = [8, 128], strides = [1, 1]} : vector<8x512xf32> to vector<8x128xf32>
    %16 = arith.negf %15 : vector<8x128xf32>
    %17 = math.exp %16 : vector<8x128xf32>
    %cst_11 = arith.constant 1.000000e+00 : f32
    %18 = vector.broadcast %cst_11 : f32 to vector<8x128xf32>
    %19 = arith.addf %18, %17 : vector<8x128xf32>
    %20 = arith.divf %18, %19 : vector<8x128xf32>
    %21 = vector.extract_strided_slice %14 {offsets = [0, 128], sizes = [8, 128], strides = [1, 1]} : vector<8x512xf32> to vector<8x128xf32>
    %22 = arith.negf %21 : vector<8x128xf32>
    %23 = math.exp %22 : vector<8x128xf32>
    %cst_12 = arith.constant 1.000000e+00 : f32
    %24 = vector.broadcast %cst_12 : f32 to vector<8x128xf32>
    %25 = arith.addf %24, %23 : vector<8x128xf32>
    %26 = arith.divf %24, %25 : vector<8x128xf32>
    %27 = vector.extract_strided_slice %14 {offsets = [0, 256], sizes = [8, 128], strides = [1, 1]} : vector<8x512xf32> to vector<8x128xf32>
    %28 = math.tanh %27 : vector<8x128xf32>
    %29 = vector.extract_strided_slice %14 {offsets = [0, 384], sizes = [8, 128], strides = [1, 1]} : vector<8x512xf32> to vector<8x128xf32>
    %30 = arith.negf %29 : vector<8x128xf32>
    %31 = math.exp %30 : vector<8x128xf32>
    %cst_13 = arith.constant 1.000000e+00 : f32
    %32 = vector.broadcast %cst_13 : f32 to vector<8x128xf32>
    %33 = arith.addf %32, %31 : vector<8x128xf32>
    %34 = arith.divf %32, %33 : vector<8x128xf32>
    %35 = arith.mulf %26, %6 : vector<8x128xf32>
    %36 = arith.mulf %20, %28 : vector<8x128xf32>
    %37 = arith.addf %35, %36 : vector<8x128xf32>
    %38 = math.tanh %37 : vector<8x128xf32>
    %39 = arith.mulf %34, %38 : vector<8x128xf32>
    %c0_14 = arith.constant 0 : index
    %c0_15 = arith.constant 0 : index
    %40 = vector.load %arg7[%c0_14, %c0_15] : memref<8x128xf32, #tpu.memory_space<vmem>>, vector<8x128xf32>
    tpu.vector_store %arg7[%c0_14, %c0_15], %39 {strides = array<i32>} : memref<8x128xf32, #tpu.memory_space<vmem>>, vector<8x128xf32>,
    %c0_16 = arith.constant 0 : index
    %c0_17 = arith.constant 0 : index
    %41 = vector.load %arg8[%c0_16, %c0_17] : memref<8x128xf32, #tpu.memory_space<vmem>>, vector<8x128xf32>
    tpu.vector_store %arg8[%c0_16, %c0_17], %37 {strides = array<i32>} : memref<8x128xf32, #tpu.memory_space<vmem>>, vector<8x128xf32>,
    %42 = arith.truncf %39 : vector<8x128xf32> to vector<8x128xbf16>
    %c0_18 = arith.constant 0 : index
    %c0_19 = arith.constant 0 : index
    %c0_20 = arith.constant 0 : index
    %43 = vector.load %arg4[%c0_18, %c0_19, %c0_20] : memref<1x8x128xbf16, #tpu.memory_space<vmem>>, vector<1x8x128xbf16>
    %44 = vector.shape_cast %43 : vector<1x8x128xbf16> to vector<8x128xbf16>
    %45 = vector.shape_cast %42 : vector<8x128xbf16> to vector<1x8x128xbf16>
    tpu.vector_store %arg4[%c0_18, %c0_19, %c0_20], %45 {strides = array<i32>} : memref<1x8x128xbf16, #tpu.memory_space<vmem>>, vector<1x8x128xbf16>,
    %c0_21 = arith.constant 0 : index
    %c0_22 = arith.constant 0 : index
    %46 = vector.load %arg5[%c0_21, %c0_22] : memref<8x128xf32, #tpu.memory_space<vmem>>, vector<8x128xf32>
    tpu.vector_store %arg5[%c0_21, %c0_22], %39 {strides = array<i32>} : memref<8x128xf32, #tpu.memory_space<vmem>>, vector<8x128xf32>,
    %c0_23 = arith.constant 0 : index
    %c0_24 = arith.constant 0 : index
    %47 = vector.load %arg6[%c0_23, %c0_24] : memref<8x128xf32, #tpu.memory_space<vmem>>, vector<8x128xf32>
    tpu.vector_store %arg6[%c0_23, %c0_24], %37 {strides = array<i32>} : memref<8x128xf32, #tpu.memory_space<vmem>>, vector<8x128xf32>,
    return
  }
  func.func @transform_0(%arg0: i32) -> (i32, i32, i32) {
    %c0_i32 = arith.constant 0 : i32
    %c0_i32_0 = arith.constant 0 : i32
    %c0_i32_1 = arith.constant 0 : i32
    return %arg0, %c0_i32, %c0_i32_0 : i32, i32, i32
  }
  func.func @transform_1(%arg0: i32) -> (i32, i32) {
    %c0_i32 = arith.constant 0 : i32
    %c0_i32_0 = arith.constant 0 : i32
    %c0_i32_1 = arith.constant 0 : i32
    return %c0_i32, %c0_i32_0 : i32, i32
  }
  func.func @transform_2(%arg0: i32) -> (i32, i32) {
    %c0_i32 = arith.constant 0 : i32
    %c0_i32_0 = arith.constant 0 : i32
    %c0_i32_1 = arith.constant 0 : i32
    return %c0_i32, %c0_i32_0 : i32, i32
  }
  func.func @transform_3(%arg0: i32) -> (i32, i32, i32) {
    %c0_i32 = arith.constant 0 : i32
    %c0_i32_0 = arith.constant 0 : i32
    %c0_i32_1 = arith.constant 0 : i32
    return %arg0, %c0_i32, %c0_i32_0 : i32, i32, i32
  }
  func.func @transform_4(%arg0: i32) -> (i32, i32) {
    %c0_i32 = arith.constant 0 : i32
    %c0_i32_0 = arith.constant 0 : i32
    %c0_i32_1 = arith.constant 0 : i32
    return %c0_i32, %c0_i32_0 : i32, i32
  }
  func.func @transform_5(%arg0: i32) -> (i32, i32) {
    %c0_i32 = arith.constant 0 : i32
    %c0_i32_0 = arith.constant 0 : i32
    %c0_i32_1 = arith.constant 0 : i32
    return %c0_i32, %c0_i32_0 : i32, i32
  }
}

module attributes {stable_mosaic.version = 11 : i64} {
  func.func @_decoder_kernel(%arg0: i32, %arg1: memref<5xi32, #tpu.memory_space<smem>>, %arg2: memref<1x8x128xf32, #tpu.memory_space<vmem>>, %arg3: memref<8x8x128xbf16, #tpu.memory_space<vmem>>, %arg4: memref<8x128xf32, #tpu.memory_space<vmem>>, %arg5: memref<8x128xf32, #tpu.memory_space<vmem>>, %arg6: memref<256x512xbf16, #tpu.memory_space<vmem>>, %arg7: memref<1x512xf32, #tpu.memory_space<vmem>>, %arg8: memref<128x256xbf16, #tpu.memory_space<vmem>>, %arg9: memref<1x256xf32, #tpu.memory_space<vmem>>, %arg10: memref<256x128xbf16, #tpu.memory_space<vmem>>, %arg11: memref<1x8x256xf32, #tpu.memory_space<vmem>>, %arg12: memref<8x128xf32, #tpu.memory_space<vmem>>, %arg13: memref<8x128xf32, #tpu.memory_space<vmem>>, %arg14: memref<8x128xf32, #tpu.memory_space<vmem>>) attributes {dimension_semantics = [#tpu.dimension_semantics<arbitrary>], iteration_bounds = array<i64: 5>, scalar_prefetch = 1 : i64, scratch_operands = 3 : i64, tpu.core_type = #tpu.core_type<tc>, window_params = [{transform_indices = @transform_0, window_bounds = array<i64: 1, 8, 128>}, {pipeline_mode = #tpu.pipeline_mode<synchronous>, transform_indices = @transform_1, window_bounds = array<i64: 8, 8, 128>}, {pipeline_mode = #tpu.pipeline_mode<synchronous>, transform_indices = @transform_2, window_bounds = array<i64: 8, 128>}, {pipeline_mode = #tpu.pipeline_mode<synchronous>, transform_indices = @transform_3, window_bounds = array<i64: 8, 128>}, {pipeline_mode = #tpu.pipeline_mode<synchronous>, transform_indices = @transform_4, window_bounds = array<i64: 256, 512>}, {pipeline_mode = #tpu.pipeline_mode<synchronous>, transform_indices = @transform_5, window_bounds = array<i64: 1, 512>}, {pipeline_mode = #tpu.pipeline_mode<synchronous>, transform_indices = @transform_6, window_bounds = array<i64: 128, 256>}, {pipeline_mode = #tpu.pipeline_mode<synchronous>, transform_indices = @transform_7, window_bounds = array<i64: 1, 256>}, {pipeline_mode = #tpu.pipeline_mode<synchronous>, transform_indices = @transform_8, window_bounds = array<i64: 256, 128>}, {transform_indices = @transform_9, window_bounds = array<i64: 1, 8, 256>}]} {
    %c0_i32 = arith.constant 0 : i32
    %0 = arith.cmpi eq, %arg0, %c0_i32 : i32
    %1 = arith.extui %0 : i1 to i32
    %c0_i32_0 = arith.constant 0 : i32
    %2 = arith.cmpi ne, %1, %c0_i32_0 : i32
    scf.if %2 {
      %c0_43 = arith.constant 0 : index
      %c0_44 = arith.constant 0 : index
      %85 = vector.load %arg4[%c0_43, %c0_44] : memref<8x128xf32, #tpu.memory_space<vmem>>, vector<8x128xf32>
      %c0_45 = arith.constant 0 : index
      %c0_46 = arith.constant 0 : index
      %86 = vector.load %arg12[%c0_45, %c0_46] : memref<8x128xf32, #tpu.memory_space<vmem>>, vector<8x128xf32>
      tpu.vector_store %arg12[%c0_45, %c0_46], %85 {strides = array<i32>} : memref<8x128xf32, #tpu.memory_space<vmem>>, vector<8x128xf32>,
      %c0_47 = arith.constant 0 : index
      %c0_48 = arith.constant 0 : index
      %87 = vector.load %arg5[%c0_47, %c0_48] : memref<8x128xf32, #tpu.memory_space<vmem>>, vector<8x128xf32>
      %c0_49 = arith.constant 0 : index
      %c0_50 = arith.constant 0 : index
      %88 = vector.load %arg13[%c0_49, %c0_50] : memref<8x128xf32, #tpu.memory_space<vmem>>, vector<8x128xf32>
      tpu.vector_store %arg13[%c0_49, %c0_50], %87 {strides = array<i32>} : memref<8x128xf32, #tpu.memory_space<vmem>>, vector<8x128xf32>,
      %cst_51 = arith.constant 0.000000e+00 : f32
      %89 = vector.broadcast %cst_51 : f32 to vector<8x128xf32>
      %c0_52 = arith.constant 0 : index
      %c0_53 = arith.constant 0 : index
      %90 = vector.load %arg14[%c0_52, %c0_53] : memref<8x128xf32, #tpu.memory_space<vmem>>, vector<8x128xf32>
      tpu.vector_store %arg14[%c0_52, %c0_53], %89 {strides = array<i32>} : memref<8x128xf32, #tpu.memory_space<vmem>>, vector<8x128xf32>,
    } else {
    }
    %3 = arith.index_cast %arg0 : i32 to index
    %4 = memref.load %arg1[%3] : memref<5xi32, #tpu.memory_space<smem>>
    %c0_i32_1 = arith.constant 0 : i32
    %5 = arith.cmpi sgt, %4, %c0_i32_1 : i32
    %6 = arith.extui %5 : i1 to i32
    %7 = arith.sitofp %6 : i32 to f32
    %c0 = arith.constant 0 : index
    %c0_2 = arith.constant 0 : index
    %c0_3 = arith.constant 0 : index
    %8 = vector.load %arg2[%c0, %c0_2, %c0_3] : memref<1x8x128xf32, #tpu.memory_space<vmem>>, vector<1x8x128xf32>
    %9 = vector.shape_cast %8 : vector<1x8x128xf32> to vector<8x128xf32>
    %10 = vector.broadcast %7 : f32 to vector<8x128xf32>
    %11 = arith.mulf %10, %9 : vector<8x128xf32>
    %cst = arith.constant 1.000000e+00 : f32
    %12 = arith.subf %cst, %7 : f32
    %c0_4 = arith.constant 0 : index
    %c0_5 = arith.constant 0 : index
    %13 = vector.load %arg14[%c0_4, %c0_5] : memref<8x128xf32, #tpu.memory_space<vmem>>, vector<8x128xf32>
    %14 = vector.broadcast %12 : f32 to vector<8x128xf32>
    %15 = arith.mulf %14, %13 : vector<8x128xf32>
    %16 = arith.addf %11, %15 : vector<8x128xf32>
    %c0_6 = arith.constant 0 : index
    %c0_7 = arith.constant 0 : index
    %17 = vector.load %arg12[%c0_6, %c0_7] : memref<8x128xf32, #tpu.memory_space<vmem>>, vector<8x128xf32>
    %c0_8 = arith.constant 0 : index
    %c0_9 = arith.constant 0 : index
    %18 = vector.load %arg13[%c0_8, %c0_9] : memref<8x128xf32, #tpu.memory_space<vmem>>, vector<8x128xf32>
    %19 = arith.truncf %16 : vector<8x128xf32> to vector<8x128xbf16>
    %20 = arith.truncf %17 : vector<8x128xf32> to vector<8x128xbf16>
    %21 = tpu.concatenate %19, %20 in 1 : vector<8x128xbf16>, vector<8x128xbf16> -> vector<8x256xbf16>
    %c0_10 = arith.constant 0 : index
    %c0_11 = arith.constant 0 : index
    %22 = vector.load %arg6[%c0_10, %c0_11] : memref<256x512xbf16, #tpu.memory_space<vmem>>, vector<256x512xbf16>
    %cst_12 = arith.constant dense<0.000000e+00> : vector<8x512xf32>
    %23 = tpu.matmul %21, %22, %cst_12 {dimension_numbers = #tpu.dot_dimension_numbers<[1], [0], [0], [1], [0, 0, 1, 1], [], []>} : vector<8x256xbf16>, vector<256x512xbf16>, vector<8x512xf32> -> vector<8x512xf32>
    %c0_13 = arith.constant 0 : index
    %c0_14 = arith.constant 0 : index
    %24 = vector.load %arg7[%c0_13, %c0_14] : memref<1x512xf32, #tpu.memory_space<vmem>>, vector<1x512xf32>
    %25 = vector.broadcast %24 : vector<1x512xf32> to vector<8x512xf32>
    %26 = arith.addf %23, %25 : vector<8x512xf32>
    %27 = vector.extract_strided_slice %26 {offsets = [0, 0], sizes = [8, 128], strides = [1, 1]} : vector<8x512xf32> to vector<8x128xf32>
    %28 = arith.negf %27 : vector<8x128xf32>
    %29 = math.exp %28 : vector<8x128xf32>
    %cst_15 = arith.constant 1.000000e+00 : f32
    %30 = vector.broadcast %cst_15 : f32 to vector<8x128xf32>
    %31 = arith.addf %30, %29 : vector<8x128xf32>
    %32 = arith.divf %30, %31 : vector<8x128xf32>
    %33 = vector.extract_strided_slice %26 {offsets = [0, 128], sizes = [8, 128], strides = [1, 1]} : vector<8x512xf32> to vector<8x128xf32>
    %34 = arith.negf %33 : vector<8x128xf32>
    %35 = math.exp %34 : vector<8x128xf32>
    %cst_16 = arith.constant 1.000000e+00 : f32
    %36 = vector.broadcast %cst_16 : f32 to vector<8x128xf32>
    %37 = arith.addf %36, %35 : vector<8x128xf32>
    %38 = arith.divf %36, %37 : vector<8x128xf32>
    %39 = vector.extract_strided_slice %26 {offsets = [0, 256], sizes = [8, 128], strides = [1, 1]} : vector<8x512xf32> to vector<8x128xf32>
    %40 = math.tanh %39 : vector<8x128xf32>
    %41 = vector.extract_strided_slice %26 {offsets = [0, 384], sizes = [8, 128], strides = [1, 1]} : vector<8x512xf32> to vector<8x128xf32>
    %42 = arith.negf %41 : vector<8x128xf32>
    %43 = math.exp %42 : vector<8x128xf32>
    %cst_17 = arith.constant 1.000000e+00 : f32
    %44 = vector.broadcast %cst_17 : f32 to vector<8x128xf32>
    %45 = arith.addf %44, %43 : vector<8x128xf32>
    %46 = arith.divf %44, %45 : vector<8x128xf32>
    %47 = arith.mulf %38, %18 : vector<8x128xf32>
    %48 = arith.mulf %32, %40 : vector<8x128xf32>
    %49 = arith.addf %47, %48 : vector<8x128xf32>
    %50 = math.tanh %49 : vector<8x128xf32>
    %51 = arith.mulf %46, %50 : vector<8x128xf32>
    %c0_18 = arith.constant 0 : index
    %c0_19 = arith.constant 0 : index
    %52 = vector.load %arg12[%c0_18, %c0_19] : memref<8x128xf32, #tpu.memory_space<vmem>>, vector<8x128xf32>
    tpu.vector_store %arg12[%c0_18, %c0_19], %51 {strides = array<i32>} : memref<8x128xf32, #tpu.memory_space<vmem>>, vector<8x128xf32>,
    %c0_20 = arith.constant 0 : index
    %c0_21 = arith.constant 0 : index
    %53 = vector.load %arg13[%c0_20, %c0_21] : memref<8x128xf32, #tpu.memory_space<vmem>>, vector<8x128xf32>
    tpu.vector_store %arg13[%c0_20, %c0_21], %49 {strides = array<i32>} : memref<8x128xf32, #tpu.memory_space<vmem>>, vector<8x128xf32>,
    %c0_22 = arith.constant 0 : index
    %c0_23 = arith.constant 0 : index
    %c0_24 = arith.constant 0 : index
    %54 = vector.load %arg3[%c0_22, %c0_23, %c0_24] : memref<8x8x128xbf16, #tpu.memory_space<vmem>>, vector<8x8x128xbf16>
    %55 = arith.truncf %51 : vector<8x128xf32> to vector<8x128xbf16>
    %56 = vector.shape_cast %55 : vector<8x128xbf16> to vector<8x1x128xbf16>
    "tpu.trace_start"() <{level = 10 : i32, message = "bqh,bsh->bqs"}> : () -> ()
    %cst_25 = arith.constant dense<0.000000e+00> : vector<8x1x8xf32>
    %57 = tpu.matmul %56, %54, %cst_25 {dimension_numbers = #tpu.dot_dimension_numbers<[2], [2], [1], [1], [0, 0, 0, 1, 1, 1], [0], [0]>} : vector<8x1x128xbf16>, vector<8x8x128xbf16>, vector<8x1x8xf32> -> vector<8x1x8xf32>
    "tpu.trace_stop"() : () -> ()
    %cst_26 = arith.constant dense<0xFF800000> : vector<8x1xf32>
    %58 = vector.multi_reduction <maximumf>, %57, %cst_26 [2] : vector<8x1x8xf32> to vector<8x1xf32>
    %59 = vector.shape_cast %58 : vector<8x1xf32> to vector<8x1x1xf32>
    %60 = vector.broadcast %59 : vector<8x1x1xf32> to vector<8x1x8xf32>
    %61 = arith.subf %57, %60 : vector<8x1x8xf32>
    %62 = math.exp %61 : vector<8x1x8xf32>
    %cst_27 = arith.constant dense<0.000000e+00> : vector<8x1xf32>
    %63 = vector.multi_reduction <add>, %62, %cst_27 [2] : vector<8x1x8xf32> to vector<8x1xf32>
    %64 = vector.shape_cast %63 : vector<8x1xf32> to vector<8x1x1xf32>
    %65 = tpu.reciprocal %64 {approx = true} : vector<8x1x1xf32> -> vector<8x1x1xf32>
    %66 = vector.broadcast %65 : vector<8x1x1xf32> to vector<8x1x8xf32>
    %67 = arith.mulf %62, %66 : vector<8x1x8xf32>
    %68 = arith.truncf %67 : vector<8x1x8xf32> to vector<8x1x8xbf16>
    "tpu.trace_start"() <{level = 10 : i32, message = "bqs,bsh->bqh"}> : () -> ()
    %cst_28 = arith.constant dense<0.000000e+00> : vector<8x1x128xf32>
    %69 = tpu.matmul %68, %54, %cst_28 {dimension_numbers = #tpu.dot_dimension_numbers<[2], [1], [1], [2], [0, 0, 0, 1, 1, 2], [0], [0]>} : vector<8x1x8xbf16>, vector<8x8x128xbf16>, vector<8x1x128xf32> -> vector<8x1x128xf32>
    "tpu.trace_stop"() : () -> ()
    %cst_29 = arith.constant dense<0.000000e+00> : vector<8x128xf32>
    %70 = vector.multi_reduction <add>, %69, %cst_29 [1] : vector<8x1x128xf32> to vector<8x128xf32>
    %71 = arith.addf %70, %51 : vector<8x128xf32>
    %72 = arith.truncf %71 : vector<8x128xf32> to vector<8x128xbf16>
    %c0_30 = arith.constant 0 : index
    %c0_31 = arith.constant 0 : index
    %73 = vector.load %arg8[%c0_30, %c0_31] : memref<128x256xbf16, #tpu.memory_space<vmem>>, vector<128x256xbf16>
    %cst_32 = arith.constant dense<0.000000e+00> : vector<8x256xf32>
    %74 = tpu.matmul %72, %73, %cst_32 {dimension_numbers = #tpu.dot_dimension_numbers<[1], [0], [0], [1], [0, 0, 1, 1], [], []>} : vector<8x128xbf16>, vector<128x256xbf16>, vector<8x256xf32> -> vector<8x256xf32>
    %c0_33 = arith.constant 0 : index
    %c0_34 = arith.constant 0 : index
    %75 = vector.load %arg9[%c0_33, %c0_34] : memref<1x256xf32, #tpu.memory_space<vmem>>, vector<1x256xf32>
    %76 = vector.broadcast %75 : vector<1x256xf32> to vector<8x256xf32>
    %77 = arith.addf %74, %76 : vector<8x256xf32>
    %c0_35 = arith.constant 0 : index
    %c0_36 = arith.constant 0 : index
    %c0_37 = arith.constant 0 : index
    %78 = vector.load %arg11[%c0_35, %c0_36, %c0_37] : memref<1x8x256xf32, #tpu.memory_space<vmem>>, vector<1x8x256xf32>
    %79 = vector.shape_cast %78 : vector<1x8x256xf32> to vector<8x256xf32>
    %80 = vector.shape_cast %77 : vector<8x256xf32> to vector<1x8x256xf32>
    tpu.vector_store %arg11[%c0_35, %c0_36, %c0_37], %80 {strides = array<i32>} : memref<1x8x256xf32, #tpu.memory_space<vmem>>, vector<1x8x256xf32>,
    %81 = arith.truncf %77 : vector<8x256xf32> to vector<8x256xbf16>
    %c0_38 = arith.constant 0 : index
    %c0_39 = arith.constant 0 : index
    %82 = vector.load %arg10[%c0_38, %c0_39] : memref<256x128xbf16, #tpu.memory_space<vmem>>, vector<256x128xbf16>
    %cst_40 = arith.constant dense<0.000000e+00> : vector<8x128xf32>
    %83 = tpu.matmul %81, %82, %cst_40 {dimension_numbers = #tpu.dot_dimension_numbers<[1], [0], [0], [1], [0, 0, 1, 1], [], []>} : vector<8x256xbf16>, vector<256x128xbf16>, vector<8x128xf32> -> vector<8x128xf32>
    %c0_41 = arith.constant 0 : index
    %c0_42 = arith.constant 0 : index
    %84 = vector.load %arg14[%c0_41, %c0_42] : memref<8x128xf32, #tpu.memory_space<vmem>>, vector<8x128xf32>
    tpu.vector_store %arg14[%c0_41, %c0_42], %83 {strides = array<i32>} : memref<8x128xf32, #tpu.memory_space<vmem>>, vector<8x128xf32>,
    return
  }
  func.func @transform_0(%arg0: i32, %arg1: memref<5xi32, #tpu.memory_space<smem>>) -> (i32, i32, i32) {
    %c0_i32 = arith.constant 0 : i32
    %c0_i32_0 = arith.constant 0 : i32
    %c0_i32_1 = arith.constant 0 : i32
    return %arg0, %c0_i32, %c0_i32_0 : i32, i32, i32
  }
  func.func @transform_1(%arg0: i32, %arg1: memref<5xi32, #tpu.memory_space<smem>>) -> (i32, i32, i32) {
    %c0_i32 = arith.constant 0 : i32
    %c0_i32_0 = arith.constant 0 : i32
    %c0_i32_1 = arith.constant 0 : i32
    %c0_i32_2 = arith.constant 0 : i32
    return %c0_i32, %c0_i32_0, %c0_i32_1 : i32, i32, i32
  }
  func.func @transform_2(%arg0: i32, %arg1: memref<5xi32, #tpu.memory_space<smem>>) -> (i32, i32) {
    %c0_i32 = arith.constant 0 : i32
    %c0_i32_0 = arith.constant 0 : i32
    %c0_i32_1 = arith.constant 0 : i32
    return %c0_i32, %c0_i32_0 : i32, i32
  }
  func.func @transform_3(%arg0: i32, %arg1: memref<5xi32, #tpu.memory_space<smem>>) -> (i32, i32) {
    %c0_i32 = arith.constant 0 : i32
    %c0_i32_0 = arith.constant 0 : i32
    %c0_i32_1 = arith.constant 0 : i32
    return %c0_i32, %c0_i32_0 : i32, i32
  }
  func.func @transform_4(%arg0: i32, %arg1: memref<5xi32, #tpu.memory_space<smem>>) -> (i32, i32) {
    %c0_i32 = arith.constant 0 : i32
    %c0_i32_0 = arith.constant 0 : i32
    %c0_i32_1 = arith.constant 0 : i32
    return %c0_i32, %c0_i32_0 : i32, i32
  }
  func.func @transform_5(%arg0: i32, %arg1: memref<5xi32, #tpu.memory_space<smem>>) -> (i32, i32) {
    %c0_i32 = arith.constant 0 : i32
    %c0_i32_0 = arith.constant 0 : i32
    %c0_i32_1 = arith.constant 0 : i32
    return %c0_i32, %c0_i32_0 : i32, i32
  }
  func.func @transform_6(%arg0: i32, %arg1: memref<5xi32, #tpu.memory_space<smem>>) -> (i32, i32) {
    %c0_i32 = arith.constant 0 : i32
    %c0_i32_0 = arith.constant 0 : i32
    %c0_i32_1 = arith.constant 0 : i32
    return %c0_i32, %c0_i32_0 : i32, i32
  }
  func.func @transform_7(%arg0: i32, %arg1: memref<5xi32, #tpu.memory_space<smem>>) -> (i32, i32) {
    %c0_i32 = arith.constant 0 : i32
    %c0_i32_0 = arith.constant 0 : i32
    %c0_i32_1 = arith.constant 0 : i32
    return %c0_i32, %c0_i32_0 : i32, i32
  }
  func.func @transform_8(%arg0: i32, %arg1: memref<5xi32, #tpu.memory_space<smem>>) -> (i32, i32) {
    %c0_i32 = arith.constant 0 : i32
    %c0_i32_0 = arith.constant 0 : i32
    %c0_i32_1 = arith.constant 0 : i32
    return %c0_i32, %c0_i32_0 : i32, i32
  }
  func.func @transform_9(%arg0: i32, %arg1: memref<5xi32, #tpu.memory_space<smem>>) -> (i32, i32, i32) {
    %c0_i32 = arith.constant 0 : i32
    %c0_i32_0 = arith.constant 0 : i32
    %c0_i32_1 = arith.constant 0 : i32
    return %arg0, %c0_i32, %c0_i32_0 : i32, i32, i32
  }
}

</mosaic_0001>

<bundles_post_ra>
// kernel: seq2seq_forward.2
= control target key start
LH: loop header
LB: loop body
LE: loop exit
PB: predicated region body
PF: predicated region fallthrough
CT: control target
= control target key end

     0   :  { %11 = vsyncpa [#allocation5], 0  ;;  %s1123_s18 = smov 0   ;;  %s1197_s0 = inlined_call_operand.vmem [shape: f32[8,8,128], index: 0, kind: input, shape index: {}]   ;;  %s1198_s1 = inlined_call_operand.hbm [shape: bf16[256,512], index: 1, kind: input, shape index: {}]   ;;  %s1199_s2 = inlined_call_operand.vmem [shape: f32[1,512], index: 2, kind: input, shape index: {}]   ;;  %s1200_s3 = inlined_call_operand.vmem [shape: bf16[8,8,128], index: 3, kind: output, shape index: {0}]   ;;  %s1201_s4 = inlined_call_operand.vmem [shape: f32[8,128], index: 4, kind: output, shape index: {1}]   ;;  %s1202_s5 = inlined_call_operand.vmem [shape: f32[8,128], index: 5, kind: output, shape index: {2}]  }
   0x1 LB: > { %s1129_s19 = sadd.s32 4294967295, %s1087_s18   ;;  %p838_p0 = scmp.ge.s32.totalorder %s1087_s18, 1  ;;  %s1087_s18 = sphi %s1123_s18, %s17_s18  }
   0x2   : > { %p158_p1 = scmp.lt.s32.totalorder %s1087_s18, 9  ;;  %s1089_s20 = smov [#allocation4]  }
   0x3   : > { %s170_s21 = sshll.u32 %s1089_s20, 4  ;;  %p1203_p4 = scmp.eq.s32.totalorder %s1129_s19, 0  ;;  %s171_s21 = int_to_ptr.vmem [resolvable:$true] %s170_s21 }
   0x4   : > { %p1134_p3 = pnand %p838_p0, %p158_p1  ;;  %s1049_s26 = scalar_lea.hbm %s1198_s1, 8192 }
   0x5   : > { %p1050_p7 = scmp.ne.s32.totalorder %s1198_s1, %s1049_s26  ;;  %p1056_p11 = scmp.lt.u32.totalorder %s1049_s26, %s1198_s1 }
   0x6   : > { %s1205_s22 = scalar_select %p1134_p3, 1, 0 }
   0x7   : > { %p919_p5 = pneg %p1134_p3 }
   0x9   : > { %p1143_p6 = pnand %p1203_p4, %p919_p5 }
   0xb   : > { %p1051_p8 = pneg %p1143_p6 }
   0xd   : > { %p1052_p9 = pnand %p1051_p8, %p1050_p7 }
   0xf   : > { %p1053_p10 = pneg %p1052_p9 }
  0x11   : > { %p1058_p12 = pnand %p1056_p11, %p1053_p10 }
  0x13   : > { %1061 = shalt.err (!%p1058_p12)
}
  0x14   : > { %s1062_s6 = scalar_lea.vmem %s171_s21, 8192  ;;  %p1070_p5 = scmp.lt.s32.totalorder %s171_s21, %s171_s21 }
  0x15   : > { %p1063_p13 = scmp.ne.s32.totalorder %s171_s21, %s1062_s6  ;;  %p1071_p2 = scmp.lt.s32.totalorder %s1062_s6, %s1062_s6 }
  0x17   : > { %p1065_p0 = pnand %p1063_p13, %p1051_p8  ;;  %p1072_p4 = por %p1071_p2, %p1070_p5 }
  0x19   : > { %p1066_p1 = pneg %p1065_p0 }
  0x1b   : > { %p1073_p3 = pnand %p1072_p4, %p1066_p1 }
  0x1d   : > { %1076 = shalt.err (!%p1073_p3)
}
  0x1e   : > { %s1090_s7 = smov 256   ;;  %s1091_s8 = smov 16  }
  0x1f   : > { %922 = dma.hbm_to_vmem [thread:$0]  (!%p1143_p6), %s1198_s1, 8192, %s171_s21, [#allocation5], %s1090_s7, %s1090_s7, %s1091_s8  }
  0x20   : > { %p1207_p7 = scmp.ne.s32.totalorder %s1205_s22, 0 }
  0x21   : > { %p1208_p9 = scmp.eq.s32.totalorder (!%p1207_p7), %s1129_s19, 0 }
  0x22   : > { %196 = sbr.rel (%p1207_p7) target bundleno = 378 (0x17a), region = 32 }
  0x29   : > { %1082 = dma.done.wait (%p1208_p9), [#allocation5], 8192   ;;  %p1209_p8 = pmov %p1208_p9 }
  0x2a   : > { %p222_p2 = scmp.lt.s32.totalorder %s1129_s19, 7  ;;  %p1210_p3 = scmp.ne.s32.totalorder %s1129_s19, 0 }
  0x2b   : > { %1084 = vsyncadd (%p1209_p8), [#allocation5], 4294959104  ;;  %v1092_v0 = vmov (!%p1210_p3), 0.0  }
  0x2c   : > { %s223_s11 = scalar_select %p222_p2, %s1129_s19, 7 }
  0x2d   : > { %233 = sbr.rel (%p1210_p3) target bundleno = 52 (0x34), region = 40  ;;  %234 = vst [vmem:[#allocation2] sm:$0xff] (!%p1210_p3), %v1092_v0  ;;  %235 = vst [vmem:[#allocation3] sm:$0xff] (!%p1210_p3), %v1092_v0 }
  0x2e   : > { %s843_s12 = sshll.u32 %s223_s11, 3  ;;  %s844_s13 = sshll.u32 %s223_s11, 2 }
  0x2f   : > { %s1174_s16 = scalar_lea.vmem %s1197_s0, %s843_s12  ;;  %s1179_s21 = scalar_lea.vmem %s1200_s3, %s844_s13 }
  0x34 PF: > { %v937_v1 = vld [vmem:[#allocation4 + $0x4] ss:$16 sps:$4 sm:$0xff]   ;;  %v939_v2 = vld [vmem:[#allocation4] ss:$16 sps:$4 sm:$0xff]   ;;  %v948_v6 = vld [vmem:[#allocation4 + $0xc] ss:$16 sps:$4 sm:$0xff]  }
  0x35   : > { %647 = vmatprep.subr.bf16.mxu0 %v937_v1  ;;  %v940_v3 = vld [vmem:[#allocation4 + $0x24] ss:$16 sps:$4 sm:$0xff]   ;;  %v942_v4 = vld [vmem:[#allocation4 + $0x20] ss:$16 sps:$4 sm:$0xff]   ;;  %v951_v7 = vld [vmem:[#allocation4 + $0x8] ss:$16 sps:$4 sm:$0xff]   ;;  %688 = vmatprep.subr.bf16.mxu1 %v948_v6 }
  0x36   : > { %648 = vmatpush1.bf16.msra.mxu0 %v939_v2  ;;  %v943_v5 = vld [vmem:[#allocation4 + $0x44] ss:$16 sps:$4 sm:$0xff]   ;;  %v945_v8 = vld [vmem:[#allocation4 + $0x40] ss:$16 sps:$4 sm:$0xff]   ;;  %689 = vmatpush1.bf16.msra.mxu1 %v951_v7  ;;  %v954_v10 = vld [vmem:[#allocation4 + $0x2c] ss:$16 sps:$4 sm:$0xff]  }
  0x37   : > { %649 = vmatprep.subr.bf16.mxu0 %v940_v3  ;;  %v946_v9 = vld [vmem:[#allocation4 + $0x64] ss:$16 sps:$4 sm:$0xff]   ;;  %v957_v11 = vld [vmem:[#allocation4 + $0x28] ss:$16 sps:$4 sm:$0xff]   ;;  %690 = vmatprep.subr.bf16.mxu1 %v954_v10  ;;  %v950_v12 = vld [vmem:[#allocation4 + $0x60] ss:$16 sps:$4 sm:$0xff]  }
  0x38   : > { %v952_v13 = vld [vmem:[#allocation4 + $0x84] ss:$16 sps:$4 sm:$0xff]   ;;  %v960_v14 = vld [vmem:[#allocation4 + $0x4c] ss:$16 sps:$4 sm:$0xff]   ;;  %v963_v15 = vld [vmem:[#allocation4 + $0x48] ss:$16 sps:$4 sm:$0xff]  }
  0x39   : > { %v966_v16 = vld [vmem:[#allocation4 + $0x6c] ss:$16 sps:$4 sm:$0xff]   ;;  %v956_v17 = vld [vmem:[#allocation4 + $0x80] ss:$16 sps:$4 sm:$0xff]   ;;  %v958_v18 = vld [vmem:[#allocation4 + $0xa4] ss:$16 sps:$4 sm:$0xff]  }
  0x3a   : > { %650 = vmatpush1.bf16.msra.mxu0 %v942_v4  ;;  %691 = vmatpush1.bf16.msra.mxu1 %v957_v11  ;;  %v969_v19 = vld [vmem:[#allocation4 + $0x68] ss:$16 sps:$4 sm:$0xff]   ;;  %v972_v20 = vld [vmem:[#allocation4 + $0x8c] ss:$16 sps:$4 sm:$0xff]   ;;  %v962_v21 = vld [vmem:[#allocation4 + $0xa0] ss:$16 sps:$4 sm:$0xff]  }
  0x3b   : > { %651 = vmatprep.subr.bf16.mxu0 %v943_v5  ;;  %692 = vmatprep.subr.bf16.mxu1 %v960_v14  ;;  %v964_v22 = vld [vmem:[#allocation4 + $0xc4] ss:$16 sps:$4 sm:$0xff]   ;;  %v975_v23 = vld [vmem:[#allocation4 + $0x88] ss:$16 sps:$4 sm:$0xff]   ;;  %v978_v24 = vld [vmem:[#allocation4 + $0xac] ss:$16 sps:$4 sm:$0xff]   ;;  %v307_v5 = vlaneseq }
  0x3c   : > { %v968_v25 = vld [vmem:[#allocation4 + $0xc0] ss:$16 sps:$4 sm:$0xff]   ;;  %v970_v26 = vld [vmem:[#allocation4 + $0xe4] ss:$16 sps:$4 sm:$0xff]   ;;  %v981_v27 = vld [vmem:[#allocation4 + $0xa8] ss:$16 sps:$4 sm:$0xff]  }
  0x3d   : > { %v984_v28 = vld [vmem:[#allocation4 + $0xcc] ss:$16 sps:$4 sm:$0xff]   ;;  %v974_v29 = vld [vmem:[#allocation4 + $0xe0] ss:$16 sps:$4 sm:$0xff]   ;;  %v976_v30 = vld [vmem:[#allocation4 + $0x104] ss:$16 sps:$4 sm:$0xff]  }
  0x3e   : > { %652 = vmatpush1.bf16.msra.mxu0 %v945_v8  ;;  %693 = vmatpush1.bf16.msra.mxu1 %v963_v15  ;;  %v987_v31 = vld [vmem:[#allocation4 + $0xc8] ss:$16 sps:$4 sm:$0xff]   ;;  %v990_v32 = vld [vmem:[#allocation4 + $0xec] ss:$16 sps:$4 sm:$0xff]   ;;  %v980_v33 = vld [vmem:[#allocation4 + $0x100] ss:$16 sps:$4 sm:$0xff]  }
  0x3f   : > { %653 = vmatprep.subr.bf16.mxu0 %v946_v9  ;;  %694 = vmatprep.subr.bf16.mxu1 %v966_v16  ;;  %v982_v34 = vld [vmem:[#allocation4 + $0x124] ss:$16 sps:$4 sm:$0xff]   ;;  %v993_v35 = vld [vmem:[#allocation4 + $0xe8] ss:$16 sps:$4 sm:$0xff]   ;;  %v996_v36 = vld [vmem:[#allocation4 + $0x10c] ss:$16 sps:$4 sm:$0xff]  }
  0x40   : > { %v986_v37 = vld [vmem:[#allocation4 + $0x120] ss:$16 sps:$4 sm:$0xff]   ;;  %v988_v38 = vld [vmem:[#allocation4 + $0x144] ss:$16 sps:$4 sm:$0xff]   ;;  %v999_v39 = vld [vmem:[#allocation4 + $0x108] ss:$16 sps:$4 sm:$0xff]  }
  0x41   : > { %v1002_v40 = vld [vmem:[#allocation4 + $0x12c] ss:$16 sps:$4 sm:$0xff]   ;;  %v237_v41 = vld [vmem:[#allocation2] sm:$0xff]  ;;  %v1005_v45 = vld [vmem:[#allocation4 + $0x128] ss:$16 sps:$4 sm:$0xff]   ;;  %v308_v6 = vshrl.u32 %v307_v5, 7 }
  0x42   : > { %654 = vmatpush1.bf16.msra.mxu0 %v950_v12  ;;  %695 = vmatpush1.bf16.msra.mxu1 %v969_v19  ;;  %v992_v42 = vld [vmem:[#allocation4 + $0x140] ss:$16 sps:$4 sm:$0xff]   ;;  %v240_v43 = vpack.c.bf16 %v237_v41, %v237_v41  ;;  %v994_v44 = vld [vmem:[#allocation4 + $0x164] ss:$16 sps:$4 sm:$0xff]   ;;  %v1008_v46 = vld [vmem:[#allocation4 + $0x14c] ss:$16 sps:$4 sm:$0xff]  }
  0x43   : > { %655 = vmatprep.subr.bf16.mxu0 %v952_v13  ;;  %696 = vmatprep.subr.bf16.mxu1 %v972_v20  ;;  %v998_v47 = vld [vmem:[#allocation4 + $0x160] ss:$16 sps:$4 sm:$0xff]   ;;  %v1000_v48 = vld [vmem:[#allocation4 + $0x184] ss:$16 sps:$4 sm:$0xff]   ;;  %v1011_v49 = vld [vmem:[#allocation4 + $0x148] ss:$16 sps:$4 sm:$0xff]  }
  0x44   : > { %679 = vmatprep.mubr.bf16.mxu0 %v240_v43  ;;  %720 = vmatprep.mubr.bf16.mxu1 %v240_v43  ;;  %v1014_v50 = vld [vmem:[#allocation4 + $0x16c] ss:$16 sps:$4 sm:$0xff]   ;;  %v1004_v51 = vld [vmem:[#allocation4 + $0x180] ss:$16 sps:$4 sm:$0xff]   ;;  %v1006_v52 = vld [vmem:[#allocation4 + $0x1a4] ss:$16 sps:$4 sm:$0xff]  }
  0x45   : > { %v1017_v53 = vld [vmem:[#allocation4 + $0x168] ss:$16 sps:$4 sm:$0xff]   ;;  %v1020_v54 = vld [vmem:[#allocation4 + $0x18c] ss:$16 sps:$4 sm:$0xff]   ;;  %v1010_v55 = vld [vmem:[#allocation4 + $0x1a0] ss:$16 sps:$4 sm:$0xff]  }
  0x46   : > { %656 = vmatpush1.bf16.msra.mxu0 %v956_v17  ;;  %697 = vmatpush1.bf16.msra.mxu1 %v975_v23  ;;  %v1012_v56 = vld [vmem:[#allocation4 + $0x1c4] ss:$16 sps:$4 sm:$0xff]   ;;  %v1023_v57 = vld [vmem:[#allocation4 + $0x188] ss:$16 sps:$4 sm:$0xff]   ;;  %v1024_v58 = vld [vmem:[#allocation4 + $0x1ac] ss:$16 sps:$4 sm:$0xff]  }
  0x47   : > { %657 = vmatprep.subr.bf16.mxu0 %v958_v18  ;;  %698 = vmatprep.subr.bf16.mxu1 %v978_v24  ;;  %v1016_v59 = vld [vmem:[#allocation4 + $0x1c0] ss:$16 sps:$4 sm:$0xff]   ;;  %v1018_v60 = vld [vmem:[#allocation4 + $0x1e4] ss:$16 sps:$4 sm:$0xff]   ;;  %v1026_v61 = vld [vmem:[#allocation4 + $0x1a8] ss:$16 sps:$4 sm:$0xff]  }
  0x48   : > { %v1027_v62 = vld [vmem:[#allocation4 + $0x1cc] ss:$16 sps:$4 sm:$0xff]   ;;  %v1022_v63 = vld [vmem:[#allocation4 + $0x1e0] ss:$16 sps:$4 sm:$0xff]   ;;  %v1029_v1 = vld [vmem:[#allocation4 + $0x1c8] ss:$16 sps:$4 sm:$0xff]  }
  0x49   : > { %v236_v0 = vld [vmem:[%s1174_s16] sm:$0xff]  ;;  %v1030_v2 = vld [vmem:[#allocation4 + $0x1ec] ss:$16 sps:$4 sm:$0xff]   ;;  %v1032_v4 = vld [vmem:[#allocation4 + $0x1e8] ss:$16 sps:$4 sm:$0xff]   ;;  %v309_v7 = vsub.s32 0, %v308_v6 }
  0x4a   : > { %658 = vmatpush1.bf16.msra.mxu0 %v962_v21  ;;  %699 = vmatpush1.bf16.msra.mxu1 %v981_v27  ;;  %v239_v3 = vpack.c.bf16 %v236_v0, %v236_v0  ;;  %v305_v8 = vld [vmem:[%s1199_s2] sm:$0xf]  ;;  %v313_v9 = vsub.s32 1, %v308_v6  ;;  %v321_v12 = vsub.s32 3, %v308_v6 }
  0x4b   : > { %659 = vmatprep.subr.bf16.mxu0 %v964_v22  ;;  %700 = vmatprep.subr.bf16.mxu1 %v984_v28  ;;  %v310_v10 = vrot.slane %v305_v8, %v309_v7  ;;  %v317_v22 = vsub.s32 2, %v308_v6 }
  0x4c   : > { %v314_v11 = vrot.slane %v305_v8, %v313_v9  ;;  %v322_v20 = vrot.slane %v305_v8, %v321_v12 }
  0x4d   : > { %v318_v27 = vrot.slane %v305_v8, %v317_v22 }
  0x4e   : > { %660 = vmatpush1.bf16.msra.mxu0 %v968_v25  ;;  %701 = vmatpush1.bf16.msra.mxu1 %v987_v31 }
  0x4f   : > { %661 = vmatprep.subr.bf16.mxu0 %v970_v26  ;;  %702 = vmatprep.subr.bf16.mxu1 %v990_v32 }
  0x52   : > { %662 = vmatpush1.bf16.msra.mxu0 %v974_v29  ;;  %703 = vmatpush1.bf16.msra.mxu1 %v993_v35 }
  0x53   : > { %663 = vmatprep.subr.bf16.mxu0 %v976_v30  ;;  %704 = vmatprep.subr.bf16.mxu1 %v996_v36 }
  0x56   : > { %664 = vmatpush1.bf16.msra.mxu0 %v980_v33  ;;  %705 = vmatpush1.bf16.msra.mxu1 %v999_v39 }
  0x57   : > { %665 = vmatprep.subr.bf16.mxu0 %v982_v34  ;;  %706 = vmatprep.subr.bf16.mxu1 %v1002_v40 }
  0x5a   : > { %666 = vmatpush1.bf16.msra.mxu0 %v986_v37  ;;  %707 = vmatpush1.bf16.msra.mxu1 %v1005_v45  ;;  %v238_v37 = vld [vmem:[#allocation3] sm:$0xff] }
  0x5b   : > { %667 = vmatprep.subr.bf16.mxu0 %v988_v38  ;;  %708 = vmatprep.subr.bf16.mxu1 %v1008_v46 }
  0x5e   : > { %668 = vmatpush1.bf16.msra.mxu0 %v992_v42  ;;  %709 = vmatpush1.bf16.msra.mxu1 %v1011_v49 }
  0x5f   : > { %669 = vmatprep.subr.bf16.mxu0 %v994_v44  ;;  %710 = vmatprep.subr.bf16.mxu1 %v1014_v50 }
  0x62   : > { %670 = vmatpush1.bf16.msra.mxu0 %v998_v47  ;;  %711 = vmatpush1.bf16.msra.mxu1 %v1017_v53 }
  0x63   : > { %671 = vmatprep.subr.bf16.mxu0 %v1000_v48  ;;  %712 = vmatprep.subr.bf16.mxu1 %v1020_v54 }
  0x66   : > { %672 = vmatpush1.bf16.msra.mxu0 %v1004_v51  ;;  %713 = vmatpush1.bf16.msra.mxu1 %v1023_v57 }
  0x67   : > { %673 = vmatprep.subr.bf16.mxu0 %v1006_v52  ;;  %714 = vmatprep.subr.bf16.mxu1 %v1024_v58 }
  0x6a   : > { %674 = vmatpush1.bf16.msra.mxu0 %v1010_v55  ;;  %715 = vmatpush1.bf16.msra.mxu1 %v1026_v61 }
  0x6b   : > { %675 = vmatprep.subr.bf16.mxu0 %v1012_v56  ;;  %716 = vmatprep.subr.bf16.mxu1 %v1027_v62 }
  0x6e   : > { %676 = vmatpush1.bf16.msra.mxu0 %v1016_v59  ;;  %717 = vmatpush1.bf16.msra.mxu1 %v1029_v1 }
  0x6f   : > { %677 = vmatprep.subr.bf16.mxu0 %v1018_v60  ;;  %718 = vmatprep.subr.bf16.mxu1 %v1030_v2 }
  0x72   : > { %678 = vmatpush1.bf16.msra.mxu0 %v1022_v63  ;;  %719 = vmatpush1.bf16.msra.mxu1 %v1032_v4 }
  0x75   : > { %680 = vmatmul.mubr.bf16.vlgmr.msra.gmra.mrb[0].mxu0 %v239_v3  ;;  %721 = vmatmul.mubr.bf16.vlgmr.msra.gmra.mrb[0].mxu1 %v239_v3 }
 0x148   : > { %v681_v13 = vpop.f32.mrb[0].mxu0  ;;  %v722_v23 = vpop.f32.mrb[0].mxu1 }
 0x149   : > { %v682_v14 = vadd.f32 %v681_v13, %v310_v10  ;;  %v683_v15 = vpop.f32.mrb[1].mxu0  ;;  %v724_v24 = vpop.f32.mrb[1].mxu1  ;;  %v723_v30 = vadd.f32 %v722_v23, %v318_v27 }
 0x14a   : > { %v684_v16 = vadd.f32 %v683_v15, %v314_v11  ;;  %v685_v17 = vpop.f32.mrb[2].mxu0  ;;  %v725_v25 = vadd.f32 %v724_v24, %v322_v20  ;;  %v726_v26 = vpop.f32.mrb[2].mxu1 }
 0x14b   : > { %v910_v18 = vmul.f32 -1.442695, %v682_v14  ;;  %v686_v19 = vpop.f32.mrb[3].mxu0  ;;  %v727_v28 = vpop.f32.mrb[3].mxu1 }
 0x14c   : > { %v911_v21 = vmul.f32 -1.442695, %v684_v16  ;;  %v912_v29 = vmul.f32 -1.442695, %v725_v25 }
 0x14d   : > { %1033 = vpow2.f32 %v910_v18 }
 0x14e   : > { %1035 = vpow2.f32 %v911_v21 }
 0x14f   : > { %1037 = vpow2.f32 %v912_v29 }
 0x150   : > { %1039 = vtanh.f32 %v723_v30 }
 0x157   : > { %v1034_v31 = vpop.eup %1033 }
 0x158   : > { %v1036_v32 = vpop.eup %1035  ;;  %v732_v33 = vadd.f32 1.0, %v1034_v31 }
 0x159   : > { %v738_v34 = vadd.f32 1.0, %v1036_v32  ;;  %v1038_v35 = vpop.eup %1037 }
 0x15a   : > { %1041 = vrcp.f32 %v732_v33  ;;  %v1040_v36 = vpop.eup %1039  ;;  %v745_v39 = vadd.f32 1.0, %v1038_v35 }
 0x15b   : > { %1043 = vrcp.f32 %v738_v34 }
 0x15c   : > { %1045 = vrcp.f32 %v745_v39 }
 0x164   : > { %v1042_v38 = vpop.eup %1041 }
 0x165   : > { %v1044_v40 = vpop.eup %1043  ;;  %v749_v41 = vmul.f32 %v1042_v38, %v1040_v36 }
 0x166   : > { %v748_v42 = vmul.f32 %v1044_v40, %v238_v37  ;;  %v1046_v44 = vpop.eup %1045 }
 0x168   : > { %v750_v43 = vadd.f32 %v749_v41, %v748_v42 }
 0x16a   : > { %1047 = vtanh.f32 %v750_v43  ;;  %754 = vst [vmem:[#allocation3] sm:$0xff] %v750_v43  ;;  %758 = vst [vmem:[%s1202_s5] sm:$0xff] %v750_v43 }
 0x174   : > { %v1048_v45 = vpop.eup %1047 }
 0x175   : > { %v752_v46 = vmul.f32 %v1048_v45, %v1046_v44 }
 0x177   : > { %753 = vst [vmem:[#allocation2] sm:$0xff] %v752_v46  ;;  %v755_v47 = vpack.c.bf16 %v752_v46, %v752_v46  ;;  %757 = vst [vmem:[%s1201_s4] sm:$0xff] %v752_v46 }
 0x179   : > { %756 = vst [vmem:[%s1179_s21] sm:$0xf] %v755_v47 }
 0x17a PF: > { %s17_s18 = sadd.s32 1, %s1087_s18  }
 0x17b   : > { %p14_p4 = scmp.ge.s32.totalorder %s17_s18, 10  }
 0x17d   :  { %16 = sbr.rel (!%p14_p4) target bundleno = 1 (0x1), region = 87 }
 0x184   :  { %790 = vsyncpa [#allocation5], 1 }
 0x185   :  { %792 = vsyncpa [#allocation5 + $0x1], 1 }

// kernel: seq2seq_forward.3
= control target key start
LH: loop header
LB: loop body
LE: loop exit
PB: predicated region body
PF: predicated region fallthrough
CT: control target
= control target key end

     0   :  { %s3499_s0 = inlined_call_operand.vmem [shape: s32[5], index: 0, kind: input, shape index: {}]   ;;  %s3500_s1 = inlined_call_operand.hbm [shape: f32[6,8,128], index: 1, kind: input, shape index: {}]   ;;  %s3501_s2 = inlined_call_operand.vmem [shape: bf16[8,8,128], index: 2, kind: input, shape index: {}]   ;;  %s3502_s3 = inlined_call_operand.vmem [shape: f32[8,128], index: 3, kind: input, shape index: {}]   ;;  %s3503_s4 = inlined_call_operand.vmem [shape: f32[8,128], index: 4, kind: input, shape index: {}]   ;;  %s3504_s5 = inlined_call_operand.vmem [shape: bf16[256,512], index: 5, kind: input, shape index: {}]   ;;  %s3505_s6 = inlined_call_operand.vmem [shape: f32[1,512], index: 6, kind: input, shape index: {}]   ;;  %s3506_s7 = inlined_call_operand.vmem [shape: bf16[128,256], index: 7, kind: input, shape index: {}]   ;;  %s3507_s8 = inlined_call_operand.vmem [shape: f32[1,256], index: 8, kind: input, shape index: {}]   ;;  %s3508_s9 = inlined_call_operand.vmem [shape: bf16[256,128], index: 9, kind: input, shape index: {}]   ;;  %s3509_s10 = inlined_call_operand.vmem [shape: f32[5,8,256], index: 10, kind: output, shape index: {}]  }
   0x1   :  { %s15_s15 = sshll.u32 %s3499_s0, 4  ;;  %s16_s15 = int_to_ptr.vmem [resolvable:$true] %s15_s15 }
   0x2   :  { %s2745_s16 = scalar_lea.vmem %s16_s15, 16  ;;  %p2750_p1 = scmp.lt.s32.totalorder %s16_s15, %s16_s15 }
   0x3   :  { %p2746_p0 = scmp.ne.s32.totalorder %s16_s15, %s2745_s16  ;;  %p2751_p2 = scmp.lt.s32.totalorder %s2745_s16, %s2745_s16 }
   0x5   :  { %p2752_p3 = por %p2751_p2, %p2750_p1 }
   0x7   :  { %p2753_p4 = pnand %p2752_p3, %p2746_p0 }
   0x9   :  { %2756 = shalt.err (!%p2753_p4)  }
   0xa   :  { %s2825_s17 = smov [#allocation6]  }
   0xb   :  { %18 = dma.vmem_to_smem %s16_s15, 16, %s2825_s17, [#allocation5] }
   0xc   :  { %2803 = dma.done.wait [#allocation5], 16 }
   0xd   :  { %2804 = vsyncadd [#allocation5], 4294967280 }
   0xe   :  { %20 = sfence }
   0xf   :  { %21 = vsyncpa [#allocation8], 0 }
  0x10   :  { %23 = vsyncpa [#allocation8 + $0x1], 0  ;;  %s2890_s18 = smov 0   ;;  %s2892_s19 = smov 0  }
  0x11   :  { %s2894_s0 = smov 0   ;;  %s2896_s20 = smov 0  }
  0x12 LB: > { %s2909_s21 = sadd.s32 4294967295, %s2823_s20   ;;  %s2912_s22 = sadd.s32 1, %s2823_s20   ;;  %s2823_s20 = sphi %s2896_s20, %s3517_s20   ;;  %s2819_s0 = sphi %s2894_s0, %s3516_s0   ;;  %s2815_s19 = sphi %s2892_s19, %s3515_s19   ;;  %s2811_s18 = sphi %s2890_s18, %s3514_s18  }
  0x13   : > { %s33_s23 = ssub.s32 %s2823_s20, %s2912_s22  ;;  %s36_s24 = sadd.s32 1, %s2819_s0 }
  0x14   : > { %p34_p5 = scmp.eq.s32.totalorder %s33_s23, 0  ;;  %p43_p6 = scmp.ne.s32.totalorder %s2819_s0, %s2815_s19 }
  0x15   : > { %p44_p7 = scmp.eq.s32.totalorder %s2823_s20, 0  ;;  %p49_p8 = scmp.ne.s32.totalorder %s2815_s19, %s2811_s18 }
  0x16   : > { %s2922_s25 = scalar_select %p34_p5, %s2819_s0, %s36_s24  }
  0x17   : > { %p45_p9 = por %p44_p7, %p43_p6  ;;  %p50_p10 = scmp.eq.s32.totalorder %s2909_s21, 0 }
  0x18   : > { %p2522_p11 = scmp.lt.s32.totalorder %s2823_s20, 5  ;;  %s291_s27 = sand.u32 1, %s2819_s0  }
  0x19   : > { %p2926_p12 = por %p50_p10, %p49_p8  ;;  %s2245_s28 = sshll.u32 %s291_s27, 3 }
  0x1a   : > { %s2246_s29 = sshll.u32 %s2823_s20, 7  ;;  %s295_s13 = scalar_lea.vmem [#allocation7], %s2245_s28 }
  0x1b   : > { %s2935_s12 = scalar_lea.hbm %s3500_s1, %s2246_s29  ;;  %s302_s14 = sshll.u32 %s295_s13, 4  ;;  %s2937_s14 = int_to_ptr.vmem [resolvable:$true] %s302_s14 }
  0x1c   : > { %p2939_p13 = pnand %p2522_p11, %p45_p9  ;;  %s292_s16 = scalar_lea.sflag [#allocation8], %s291_s27 }
  0x1d   : > { %s2757_s17 = scalar_lea.hbm %s2935_s12, 128  ;;  %s2762_s24 = scalar_lea.hbm %s3500_s1, 768 }
  0x1e   : > { %p2758_p2 = scmp.ne.s32.totalorder %s2935_s12, %s2757_s17  ;;  %p2759_p3 = pneg %p2939_p13 }
  0x1f   : > { %p2763_p6 = scmp.lt.u32.totalorder %s2935_s12, %s3500_s1  ;;  %p2764_p7 = scmp.lt.u32.totalorder %s2762_s24, %s2757_s17 }
  0x20   : > { %p2760_p4 = pnand %p2759_p3, %p2758_p2  ;;  %p2766_p9 = scmp.lt.u32.totalorder %s2757_s17, %s2935_s12 }
  0x21   : > { %p2765_p8 = por %p2764_p7, %p2763_p6 }
  0x22   : > { %p2761_p5 = pneg %p2760_p4 }
  0x23   : > { %p2767_p10 = por %p2766_p9, %p2765_p8 }
  0x25   : > { %p2768_p11 = pnand %p2767_p10, %p2761_p5 }
  0x27   : > { %2771 = shalt.err (!%p2768_p11)
}
  0x28   : > { %s2772_s27 = scalar_lea.vmem %s2937_s14, 128  ;;  %s2826_s30 = smov [#allocation7]  }
  0x29   : > { %p2773_p2 = scmp.ne.s32.totalorder %s2937_s14, %s2772_s27  ;;  %s2777_s11 = sshll.u32 %s2826_s30, 4  ;;  %s2778_s11 = int_to_ptr.vmem [resolvable:$false] %s2777_s11 }
  0x2a   : > { %s2779_s13 = scalar_lea.vmem %s2778_s11, 256  ;;  %p2780_p1 = scmp.lt.s32.totalorder %s2937_s14, %s2778_s11 }
  0x2b   : > { %p2775_p4 = pnand %p2773_p2, %p2759_p3  ;;  %p2781_p6 = scmp.lt.s32.totalorder %s2779_s13, %s2772_s27 }
  0x2d   : > { %p2776_p0 = pneg %p2775_p4  ;;  %p2782_p7 = por %p2781_p6, %p2780_p1 }
  0x2f   : > { %p2783_p8 = pnand %p2782_p7, %p2776_p0 }
  0x31   : > { %2786 = shalt.err (!%p2783_p8)
}
  0x32   : > { %2521 = dma.hbm_to_vmem [thread:$0]  (!%p2939_p13), %s2935_s12, 128, %s2937_s14, %s292_s16  }
  0x33   : > { %p3512_p5 = scmp.lt.s32.totalorder %s2823_s20, 6  ;;  %p3513_p9 = scmp.ge.s32.totalorder %s2823_s20, 1 }
  0x35   : > { %p308_p3 = pnand %p3513_p9, %p3512_p5 }
  0x36   : > { %s313_s17 = sand.u32 (!%p308_p3), 1, %s2815_s19  }
  0x37   : > { %311 = sbr.rel (%p308_p3) target bundleno = 1619 (0x653), region = 56  ;;  %s2975_s18 = sshll.u32 (!%p308_p3), %s313_s17, 3 }
  0x38   : > { %s314_s23 = scalar_lea.sflag (!%p308_p3), [#allocation8], %s313_s17  ;;  %s317_s24 = scalar_lea.vmem (!%p308_p3), [#allocation7], %s2975_s18 }
  0x3e   : > { %2806 = dma.done.wait (%p2926_p12), %s314_s23, 128  }
  0x3f   : > { %2808 = vsyncadd (%p2926_p12), %s314_s23, 4294967168  ;;  %p352_p13 = scmp.lt.s32.totalorder %s2909_s21, 4  ;;  %p2251_p0 = scmp.ne.s32.totalorder %s2909_s21, 0 }
  0x40   : > { %v362_v0 = vld [vmem:[%s3502_s3] sm:$0xff] (!%p2251_p0)  ;;  %v2827_v2 = vmov (!%p2251_p0), 0.0  }
  0x41   : > { %s353_s12 = scalar_select %p352_p13, %s2909_s21, 4 }
  0x42   : > { %361 = sbr.rel (%p2251_p0) target bundleno = 73 (0x49), region = 64  ;;  %v364_v1 = vld [vmem:[%s3503_s4] sm:$0xff] (!%p2251_p0)  ;;  %363 = vst [vmem:[#allocation2] sm:$0xff] (!%p2251_p0), %v362_v0  ;;  %366 = vst [vmem:[#allocation4] sm:$0xff] (!%p2251_p0), %v2827_v2 }
  0x43   : > { %s2365_s20 = sshll.u32 %s353_s12, 4  ;;  %365 = vst [vmem:[#allocation3] sm:$0xff] (!%p2251_p0), %v364_v1 }
  0x44   : > { %s2987_s16 = scalar_lea.vmem %s3509_s10, %s2365_s20 }
  0x49 PF: > { %v2561_v3 = vld [vmem:[%s3504_s5 + $0x4] ss:$16 sps:$4 sm:$0xff]   ;;  %v2563_v4 = vld [vmem:[%s3504_s5] ss:$16 sps:$4 sm:$0xff]   ;;  %v2572_v8 = vld [vmem:[%s3504_s5 + $0xc] ss:$16 sps:$4 sm:$0xff]  }
  0x4a   : > { %789 = vmatprep.subr.bf16.mxu0 %v2561_v3  ;;  %v2564_v5 = vld [vmem:[%s3504_s5 + $0x24] ss:$16 sps:$4 sm:$0xff]   ;;  %v2566_v6 = vld [vmem:[%s3504_s5 + $0x20] ss:$16 sps:$4 sm:$0xff]   ;;  %v2575_v9 = vld [vmem:[%s3504_s5 + $0x8] ss:$16 sps:$4 sm:$0xff]   ;;  %830 = vmatprep.subr.bf16.mxu1 %v2572_v8 }
  0x4b   : > { %790 = vmatpush1.bf16.msra.mxu0 %v2563_v4  ;;  %v2567_v7 = vld [vmem:[%s3504_s5 + $0x44] ss:$16 sps:$4 sm:$0xff]   ;;  %v2569_v10 = vld [vmem:[%s3504_s5 + $0x40] ss:$16 sps:$4 sm:$0xff]   ;;  %831 = vmatpush1.bf16.msra.mxu1 %v2575_v9  ;;  %v2578_v12 = vld [vmem:[%s3504_s5 + $0x2c] ss:$16 sps:$4 sm:$0xff]  }
  0x4c   : > { %791 = vmatprep.subr.bf16.mxu0 %v2564_v5  ;;  %v2570_v11 = vld [vmem:[%s3504_s5 + $0x64] ss:$16 sps:$4 sm:$0xff]   ;;  %v2581_v13 = vld [vmem:[%s3504_s5 + $0x28] ss:$16 sps:$4 sm:$0xff]   ;;  %832 = vmatprep.subr.bf16.mxu1 %v2578_v12  ;;  %v2574_v14 = vld [vmem:[%s3504_s5 + $0x60] ss:$16 sps:$4 sm:$0xff]  }
  0x4d   : > { %v2576_v15 = vld [vmem:[%s3504_s5 + $0x84] ss:$16 sps:$4 sm:$0xff]   ;;  %v2584_v16 = vld [vmem:[%s3504_s5 + $0x4c] ss:$16 sps:$4 sm:$0xff]   ;;  %v2587_v17 = vld [vmem:[%s3504_s5 + $0x48] ss:$16 sps:$4 sm:$0xff]  }
  0x4e   : > { %v2590_v18 = vld [vmem:[%s3504_s5 + $0x6c] ss:$16 sps:$4 sm:$0xff]   ;;  %v2580_v19 = vld [vmem:[%s3504_s5 + $0x80] ss:$16 sps:$4 sm:$0xff]   ;;  %v2582_v20 = vld [vmem:[%s3504_s5 + $0xa4] ss:$16 sps:$4 sm:$0xff]  }
  0x4f   : > { %792 = vmatpush1.bf16.msra.mxu0 %v2566_v6  ;;  %833 = vmatpush1.bf16.msra.mxu1 %v2581_v13  ;;  %v2593_v21 = vld [vmem:[%s3504_s5 + $0x68] ss:$16 sps:$4 sm:$0xff]   ;;  %v2596_v22 = vld [vmem:[%s3504_s5 + $0x8c] ss:$16 sps:$4 sm:$0xff]   ;;  %v2586_v23 = vld [vmem:[%s3504_s5 + $0xa0] ss:$16 sps:$4 sm:$0xff]  }
  0x50   : > { %793 = vmatprep.subr.bf16.mxu0 %v2567_v7  ;;  %834 = vmatprep.subr.bf16.mxu1 %v2584_v16  ;;  %v2588_v24 = vld [vmem:[%s3504_s5 + $0xc4] ss:$16 sps:$4 sm:$0xff]   ;;  %v2599_v25 = vld [vmem:[%s3504_s5 + $0x88] ss:$16 sps:$4 sm:$0xff]   ;;  %v2602_v26 = vld [vmem:[%s3504_s5 + $0xac] ss:$16 sps:$4 sm:$0xff]   ;;  %v449_v16 = vlaneseq }
  0x51   : > { %v2592_v27 = vld [vmem:[%s3504_s5 + $0xc0] ss:$16 sps:$4 sm:$0xff]   ;;  %v2594_v28 = vld [vmem:[%s3504_s5 + $0xe4] ss:$16 sps:$4 sm:$0xff]   ;;  %v2605_v29 = vld [vmem:[%s3504_s5 + $0xa8] ss:$16 sps:$4 sm:$0xff]  }
  0x52   : > { %v2608_v30 = vld [vmem:[%s3504_s5 + $0xcc] ss:$16 sps:$4 sm:$0xff]   ;;  %v2598_v31 = vld [vmem:[%s3504_s5 + $0xe0] ss:$16 sps:$4 sm:$0xff]   ;;  %v2600_v32 = vld [vmem:[%s3504_s5 + $0x104] ss:$16 sps:$4 sm:$0xff]  }
  0x53   : > { %794 = vmatpush1.bf16.msra.mxu0 %v2569_v10  ;;  %835 = vmatpush1.bf16.msra.mxu1 %v2587_v17  ;;  %s367_s15 = sld [smem:[#allocation6 + %s2909_s21]]  ;;  %v2611_v33 = vld [vmem:[%s3504_s5 + $0xc8] ss:$16 sps:$4 sm:$0xff]   ;;  %v2614_v34 = vld [vmem:[%s3504_s5 + $0xec] ss:$16 sps:$4 sm:$0xff]   ;;  %v379_v43 = vld [vmem:[#allocation2] sm:$0xff] }
  0x54   : > { %795 = vmatprep.subr.bf16.mxu0 %v2570_v11  ;;  %836 = vmatprep.subr.bf16.mxu1 %v2590_v18  ;;  %v2604_v35 = vld [vmem:[%s3504_s5 + $0x100] ss:$16 sps:$4 sm:$0xff]   ;;  %v2606_v36 = vld [vmem:[%s3504_s5 + $0x124] ss:$16 sps:$4 sm:$0xff]   ;;  %v2617_v37 = vld [vmem:[%s3504_s5 + $0xe8] ss:$16 sps:$4 sm:$0xff]   ;;  %v382_v45 = vpack.c.bf16 %v379_v43, %v379_v43 }
  0x55   : > { %v2620_v38 = vld [vmem:[%s3504_s5 + $0x10c] ss:$16 sps:$4 sm:$0xff]   ;;  %v2610_v39 = vld [vmem:[%s3504_s5 + $0x120] ss:$16 sps:$4 sm:$0xff]   ;;  %v2612_v40 = vld [vmem:[%s3504_s5 + $0x144] ss:$16 sps:$4 sm:$0xff]  }
  0x56   : > { %v2623_v41 = vld [vmem:[%s3504_s5 + $0x108] ss:$16 sps:$4 sm:$0xff]   ;;  %v2626_v42 = vld [vmem:[%s3504_s5 + $0x12c] ss:$16 sps:$4 sm:$0xff]   ;;  %v2616_v44 = vld [vmem:[%s3504_s5 + $0x140] ss:$16 sps:$4 sm:$0xff]   ;;  %821 = vmatprep.mubr.bf16.mxu0 %v382_v45  ;;  %862 = vmatprep.mubr.bf16.mxu1 %v382_v45 }
  0x57   : > { %796 = vmatpush1.bf16.msra.mxu0 %v2574_v14  ;;  %837 = vmatpush1.bf16.msra.mxu1 %v2593_v21  ;;  %v2618_v46 = vld [vmem:[%s3504_s5 + $0x164] ss:$16 sps:$4 sm:$0xff]   ;;  %v2629_v47 = vld [vmem:[%s3504_s5 + $0x128] ss:$16 sps:$4 sm:$0xff]   ;;  %v2632_v48 = vld [vmem:[%s3504_s5 + $0x14c] ss:$16 sps:$4 sm:$0xff]  }
  0x58   : > { %797 = vmatprep.subr.bf16.mxu0 %v2576_v15  ;;  %838 = vmatprep.subr.bf16.mxu1 %v2596_v22  ;;  %v2622_v49 = vld [vmem:[%s3504_s5 + $0x160] ss:$16 sps:$4 sm:$0xff]   ;;  %v2624_v50 = vld [vmem:[%s3504_s5 + $0x184] ss:$16 sps:$4 sm:$0xff]   ;;  %v2635_v51 = vld [vmem:[%s3504_s5 + $0x148] ss:$16 sps:$4 sm:$0xff]  }
  0x59   : > { %p368_p12 = scmp.gt.s32.totalorder %s367_s15, 0  ;;  %v2638_v52 = vld [vmem:[%s3504_s5 + $0x16c] ss:$16 sps:$4 sm:$0xff]   ;;  %v2628_v53 = vld [vmem:[%s3504_s5 + $0x180] ss:$16 sps:$4 sm:$0xff]   ;;  %v2828_v15 = vmov 0.0  }
  0x5a   : > { %v2630_v54 = vld [vmem:[%s3504_s5 + $0x1a4] ss:$16 sps:$4 sm:$0xff]   ;;  %v2641_v55 = vld [vmem:[%s3504_s5 + $0x168] ss:$16 sps:$4 sm:$0xff]   ;;  %v2644_v56 = vld [vmem:[%s3504_s5 + $0x18c] ss:$16 sps:$4 sm:$0xff]  }
  0x5b   : > { %798 = vmatpush1.bf16.msra.mxu0 %v2580_v19  ;;  %839 = vmatpush1.bf16.msra.mxu1 %v2599_v25  ;;  %s3120_s23 = scalar_select %p368_p12, 1, 0  ;;  %v2634_v57 = vld [vmem:[%s3504_s5 + $0x1a0] ss:$16 sps:$4 sm:$0xff]   ;;  %v2636_v60 = vld [vmem:[%s3504_s5 + $0x1c4] ss:$16 sps:$4 sm:$0xff]  }
  0x5c   : > { %799 = vmatprep.subr.bf16.mxu0 %v2582_v20  ;;  %840 = vmatprep.subr.bf16.mxu1 %v2602_v26  ;;  %v371_v58 = vld [vmem:[%s317_s24] sm:$0xff]  ;;  %v375_v59 = vld [vmem:[#allocation4] sm:$0xff]  ;;  %vm2829_vm0 = vmmov 0   ;;  %v3214_v17 = vshrl.u32 %v449_v16, 7  ;;  %vm1307_vm1 = vcmask 57344   ;;  %vm1408_vm2 = vcmask 1043456  }
  0x5d   : > { %s370_s12 = scvt.s32.f32 %s3120_s23  ;;  %v2647_v61 = vld [vmem:[%s3504_s5 + $0x188] ss:$16 sps:$4 sm:$0xff]   ;;  %v2648_v0 = vld [vmem:[%s3504_s5 + $0x1ac] ss:$16 sps:$4 sm:$0xff]   ;;  %v2640_v1 = vld [vmem:[%s3504_s5 + $0x1c0] ss:$16 sps:$4 sm:$0xff]  }
  0x5e   : > { %v2642_v2 = vld [vmem:[%s3504_s5 + $0x1e4] ss:$16 sps:$4 sm:$0xff]   ;;  %v2650_v5 = vld [vmem:[%s3504_s5 + $0x1a8] ss:$16 sps:$4 sm:$0xff]   ;;  %v2651_v6 = vld [vmem:[%s3504_s5 + $0x1cc] ss:$16 sps:$4 sm:$0xff]  }
  0x5f   : > { %800 = vmatpush1.bf16.msra.mxu0 %v2586_v23  ;;  %841 = vmatpush1.bf16.msra.mxu1 %v2605_v29  ;;  %s374_s23 = ssub.f32 1.0, %s370_s12  ;;  %v372_v62 = vstv %s370_s12  ;;  %v2646_v7 = vld [vmem:[%s3504_s5 + $0x1e0] ss:$16 sps:$4 sm:$0xff]   ;;  %v2653_v9 = vld [vmem:[%s3504_s5 + $0x1c8] ss:$16 sps:$4 sm:$0xff]   ;;  %v3217_v18 = vsub.s32 0, %v3214_v17 }
  0x60   : > { %801 = vmatprep.subr.bf16.mxu0 %v2588_v24  ;;  %842 = vmatprep.subr.bf16.mxu1 %v2608_v30  ;;  %v373_v3 = vmul.f32 %v372_v62, %v371_v58  ;;  %v2654_v10 = vld [vmem:[%s3504_s5 + $0x1ec] ss:$16 sps:$4 sm:$0xff]   ;;  %v2656_v12 = vld [vmem:[%s3504_s5 + $0x1e8] ss:$16 sps:$4 sm:$0xff]   ;;  %v3197_v13 = vld [vmem:[%s3501_s2] sm:$0xf] }
  0x61   : > { %v376_v63 = vstv %s374_s23  ;;  %v3202_v14 = vld [vmem:[%s3501_s2 + $0x4] sm:$0xf]  ;;  %v447_v19 = vld [vmem:[%s3505_s6] sm:$0xf]  ;;  %v455_v20 = vsub.s32 1, %v3214_v17  ;;  %v463_v23 = vsub.s32 3, %v3214_v17 }
  0x62   : > { %v377_v4 = vmul.f32 %v376_v63, %v375_v59  ;;  %v452_v21 = vrot.slane %v447_v19, %v3217_v18  ;;  %vm1404_vm3 = vcmask 64512   ;;  %vm1859_vm4 = vcmask 1041409  }
  0x63   : > { %802 = vmatpush1.bf16.msra.mxu0 %v2592_v27  ;;  %843 = vmatpush1.bf16.msra.mxu1 %v2611_v33  ;;  %v456_v22 = vrot.slane %v447_v19, %v455_v20  ;;  %v459_v33 = vsub.s32 2, %v3214_v17  ;;  %vm1862_vm5 = vcmask 1042434   ;;  %vm1865_vm6 = vcmask 1043459  }
  0x64   : > { %803 = vmatprep.subr.bf16.mxu0 %v2594_v28  ;;  %844 = vmatprep.subr.bf16.mxu1 %v2614_v34  ;;  %v378_v8 = vadd.f32 %v377_v4, %v373_v3  ;;  %vm1868_vm7 = vcmask 1044484   ;;  %vm1871_vm8 = vcmask 1045509   ;;  %vm1874_vm9 = vcmask 1046534  }
  0x65   : > { %vm1877_vm10 = vcmask 1047559  }
  0x66   : > { %v381_v11 = vpack.c.bf16 %v378_v8, %v378_v8 }
  0x67   : > { %804 = vmatpush1.bf16.msra.mxu0 %v2598_v31  ;;  %845 = vmatpush1.bf16.msra.mxu1 %v2617_v37  ;;  %v464_v31 = vrot.slane %v447_v19, %v463_v23  ;;  %v3264_v23 = vld [vmem:[%s3501_s2 + $0x14] sm:$0xf] }
  0x68   : > { %805 = vmatprep.subr.bf16.mxu0 %v2600_v32  ;;  %846 = vmatprep.subr.bf16.mxu1 %v2620_v38  ;;  %v460_v38 = vrot.slane %v447_v19, %v459_v33 }
  0x6b   : > { %806 = vmatpush1.bf16.msra.mxu0 %v2604_v35  ;;  %847 = vmatpush1.bf16.msra.mxu1 %v2623_v41 }
  0x6c   : > { %807 = vmatprep.subr.bf16.mxu0 %v2606_v36  ;;  %848 = vmatprep.subr.bf16.mxu1 %v2626_v42 }
  0x6f   : > { %808 = vmatpush1.bf16.msra.mxu0 %v2610_v39  ;;  %849 = vmatpush1.bf16.msra.mxu1 %v2629_v47 }
  0x70   : > { %809 = vmatprep.subr.bf16.mxu0 %v2612_v40  ;;  %850 = vmatprep.subr.bf16.mxu1 %v2632_v48  ;;  %v380_v48 = vld [vmem:[#allocation3] sm:$0xff] }
  0x73   : > { %810 = vmatpush1.bf16.msra.mxu0 %v2616_v44  ;;  %851 = vmatpush1.bf16.msra.mxu1 %v2635_v51 }
  0x74   : > { %811 = vmatprep.subr.bf16.mxu0 %v2618_v46  ;;  %852 = vmatprep.subr.bf16.mxu1 %v2638_v52 }
  0x77   : > { %812 = vmatpush1.bf16.msra.mxu0 %v2622_v49  ;;  %853 = vmatpush1.bf16.msra.mxu1 %v2641_v55  ;;  %v2830_v55 = vmov 1966171168  }
  0x78   : > { %813 = vmatprep.subr.bf16.mxu0 %v2624_v50  ;;  %854 = vmatprep.subr.bf16.mxu1 %v2644_v56  ;;  %v908_v56 = vunpack.c.l.s4 %v2830_v55 }
  0x7b   : > { %814 = vmatpush1.bf16.msra.mxu0 %v2628_v53  ;;  %855 = vmatpush1.bf16.msra.mxu1 %v2647_v61 }
  0x7c   : > { %815 = vmatprep.subr.bf16.mxu0 %v2630_v54  ;;  %856 = vmatprep.subr.bf16.mxu1 %v2648_v0 }
  0x7f   : > { %816 = vmatpush1.bf16.msra.mxu0 %v2634_v57  ;;  %857 = vmatpush1.bf16.msra.mxu1 %v2650_v5  ;;  %v909_v57 = vunpack.c.0.s8 %v908_v56 }
  0x80   : > { %817 = vmatprep.subr.bf16.mxu0 %v2636_v60  ;;  %858 = vmatprep.subr.bf16.mxu1 %v2651_v6  ;;  %v3238_v6 = vld [vmem:[%s3501_s2 + $0x8] sm:$0xf] }
  0x81   : > { %v912_v61 = vsub.s32 %v909_v57, %v3214_v17 }
  0x83   : > { %818 = vmatpush1.bf16.msra.mxu0 %v2640_v1  ;;  %859 = vmatpush1.bf16.msra.mxu1 %v2653_v9  ;;  %v3244_v9 = vld [vmem:[%s3501_s2 + $0xc] sm:$0xf] }
  0x84   : > { %819 = vmatprep.subr.bf16.mxu0 %v2642_v2  ;;  %860 = vmatprep.subr.bf16.mxu1 %v2654_v10 }
  0x87   : > { %820 = vmatpush1.bf16.msra.mxu0 %v2646_v7  ;;  %861 = vmatpush1.bf16.msra.mxu1 %v2656_v12 }
  0x88   : > { %2420 = vmatprep.subr.bf16.mxu0 %v2828_v15  ;;  %2426 = vmatprep.subr.bf16.mxu1 %v2828_v15 }
  0x8a   : > { %822 = vmatmul.mubr.bf16.vlgmr.msra.gmra.mrb[0].mxu0 %v381_v11  ;;  %863 = vmatmul.mubr.bf16.vlgmr.msra.gmra.mrb[0].mxu1 %v381_v11 }
  0x8b   : > { %2422 = vmatprep.mubr.msk.bf16.mxu0 %vm2829_vm0, %v2828_v15  ;;  %2428 = vmatprep.mubr.msk.bf16.mxu1 %vm2829_vm0, %v2828_v15 }
  0x90   : > { %2421 = vmatpush3.bf16.xpose.msra.mxu0 %v3197_v13  ;;  %2427 = vmatpush3.bf16.xpose.msra.mxu1 %v3202_v14 }
  0x91   : > { %2432 = vmatprep.subr.bf16.mxu0 %v2828_v15  ;;  %2438 = vmatprep.subr.bf16.mxu1 %v2828_v15 }
 0x15d   : > { %v823_v24 = vpop.f32.mrb[0].mxu0  ;;  %v864_v34 = vpop.f32.mrb[0].mxu1 }
 0x15e   : > { %v824_v25 = vadd.f32 %v823_v24, %v452_v21  ;;  %v825_v26 = vpop.f32.mrb[1].mxu0  ;;  %v866_v35 = vpop.f32.mrb[1].mxu1  ;;  %v865_v41 = vadd.f32 %v864_v34, %v460_v38  ;;  %v3258_v21 = vld [vmem:[%s3501_s2 + $0x10] sm:$0xf] }
 0x15f   : > { %v826_v27 = vadd.f32 %v825_v26, %v456_v22  ;;  %v827_v28 = vpop.f32.mrb[2].mxu0  ;;  %v867_v36 = vadd.f32 %v866_v35, %v464_v31  ;;  %v868_v37 = vpop.f32.mrb[2].mxu1  ;;  %v3284_v31 = vld [vmem:[%s3501_s2 + $0x1c] sm:$0xf] }
 0x160   : > { %v2316_v29 = vmul.f32 -1.442695, %v824_v25  ;;  %v828_v30 = vpop.f32.mrb[3].mxu0  ;;  %v869_v39 = vpop.f32.mrb[3].mxu1 }
 0x161   : > { %v2317_v32 = vmul.f32 -1.442695, %v826_v27  ;;  %v2318_v40 = vmul.f32 -1.442695, %v867_v36 }
 0x162   : > { %2697 = vpow2.f32 %v2316_v29  ;;  %v3278_v29 = vld [vmem:[%s3501_s2 + $0x18] sm:$0xf] }
 0x163   : > { %2699 = vpow2.f32 %v2317_v32 }
 0x164   : > { %2701 = vpow2.f32 %v2318_v40 }
 0x165   : > { %2703 = vtanh.f32 %v865_v41 }
 0x16c   : > { %v2698_v42 = vpop.eup %2697 }
 0x16d   : > { %v2700_v43 = vpop.eup %2699  ;;  %v874_v44 = vadd.f32 1.0, %v2698_v42 }
 0x16e   : > { %v880_v45 = vadd.f32 1.0, %v2700_v43  ;;  %v2702_v46 = vpop.eup %2701 }
 0x16f   : > { %2705 = vrcp.f32 %v874_v44  ;;  %v2704_v47 = vpop.eup %2703  ;;  %v887_v50 = vadd.f32 1.0, %v2702_v46 }
 0x170   : > { %2707 = vrcp.f32 %v880_v45 }
 0x171   : > { %2709 = vrcp.f32 %v887_v50 }
 0x179   : > { %v2706_v49 = vpop.eup %2705 }
 0x17a   : > { %v2708_v51 = vpop.eup %2707  ;;  %v891_v52 = vmul.f32 %v2706_v49, %v2704_v47 }
 0x17b   : > { %v890_v53 = vmul.f32 %v2708_v51, %v380_v48  ;;  %v2710_v58 = vpop.eup %2709 }
 0x17d   : > { %v892_v54 = vadd.f32 %v891_v52, %v890_v53 }
 0x17f   : > { %2711 = vtanh.f32 %v892_v54  ;;  %896 = vst [vmem:[#allocation3] sm:$0xff] %v892_v54 }
 0x189   : > { %v2712_v59 = vpop.eup %2711 }
 0x18a   : > { %v3228_v60 = vmul.f32 %v2712_v59, %v2710_v58 }
 0x18c   : > { %895 = vst [vmem:[#allocation2] sm:$0xff] %v3228_v60  ;;  %v905_v62 = vpack.c.bf16 %v3228_v60, %v3228_v60 }
 0x18e   : > { %v913_v63 = vrot.slane %v905_v62, %v912_v61 }
 0x190   : > { %v921_v0 = vrot.slane %v913_v63, %v912_v61  ;;  %v914_v1 = vcombine.high %v913_v63, %v913_v63 }
 0x192   : > { %v2319_v2 = vpack.i.b16 %v921_v0, %v921_v0  ;;  %v932_v3 = vunpack.i.h.s16 %v921_v0  ;;  %v928_v4 = vrot.slane %v914_v1, %v912_v61  ;;  %v929_v16 = vcombine.high %v921_v0, %v921_v0 }
 0x194   : > { %v943_v5 = vrot.slane %v2319_v2, %v3217_v18  ;;  %v985_v7 = vpack.i.b16 %v932_v3, %v932_v3  ;;  %v934_v10 = vunpack.i.h.s16 %v928_v4  ;;  %v2320_v11 = vpack.i.b16 %v928_v4, %v928_v4 }
 0x195   : > { %v936_v24 = vunpack.i.h.s16 %v929_v16  ;;  %v2321_v25 = vpack.i.b16 %v929_v16, %v929_v16  ;;  %v930_v27 = vcombine.high %v928_v4, %v928_v4 }
 0x196   : > { %2423 = vmatmul.mubr.bf16.vlgmr.msra.gmra.mrb[4].mxu0 %v943_v5  ;;  %v989_v8 = vrot.slane %v985_v7, %v3217_v18  ;;  %v1077_v12 = vpack.i.b16 %v934_v10, %v934_v10  ;;  %v1035_v19 = vrot.slane %v2320_v11, %v3217_v18 }
 0x197   : > { %2433 = vmatpush3.bf16.xpose.msra.mxu0 %v3238_v6  ;;  %2434 = vmatprep.mubr.msk.bf16.mxu0 %vm2829_vm0, %v2828_v15  ;;  %v1169_v26 = vpack.i.b16 %v936_v24, %v936_v24  ;;  %v1127_v28 = vrot.slane %v2321_v25, %v3217_v18  ;;  %v938_v32 = vunpack.i.h.s16 %v930_v27  ;;  %v2322_v33 = vpack.i.b16 %v930_v27, %v930_v27 }
 0x198   : > { %2429 = vmatmul.mubr.bf16.vlgmr.msra.gmra.mrb[4].mxu1 %v989_v8  ;;  %2444 = vmatprep.subr.bf16.mxu0 %v2828_v15  ;;  %v1081_v22 = vrot.slane %v1077_v12, %v3217_v18 }
 0x199   : > { %2439 = vmatpush3.bf16.xpose.msra.mxu1 %v3244_v9  ;;  %2440 = vmatprep.mubr.msk.bf16.mxu1 %vm2829_vm0, %v2828_v15  ;;  %v1173_v30 = vrot.slane %v1169_v26, %v3217_v18  ;;  %v1261_v34 = vpack.i.b16 %v938_v32, %v938_v32  ;;  %v1219_v35 = vrot.slane %v2322_v33, %v3217_v18 }
 0x19a   : > { %2450 = vmatprep.subr.bf16.mxu1 %v2828_v15 }
 0x19b   : > { %v1265_v36 = vrot.slane %v1261_v34, %v3217_v18 }
 0x19e   : > { %2435 = vmatmul.mubr.bf16.vlgmr.msra.gmra.mrb[8].mxu0 %v1035_v19 }
 0x19f   : > { %2445 = vmatpush3.bf16.xpose.msra.mxu0 %v3258_v21  ;;  %2446 = vmatprep.mubr.msk.bf16.mxu0 %vm2829_vm0, %v2828_v15 }
 0x1a0   : > { %2441 = vmatmul.mubr.bf16.vlgmr.msra.gmra.mrb[8].mxu1 %v1081_v22  ;;  %2456 = vmatprep.subr.bf16.mxu0 %v2828_v15 }
 0x1a1   : > { %2451 = vmatpush3.bf16.xpose.msra.mxu1 %v3264_v23  ;;  %2452 = vmatprep.mubr.msk.bf16.mxu1 %vm2829_vm0, %v2828_v15 }
 0x1a2   : > { %2462 = vmatprep.subr.bf16.mxu1 %v2828_v15 }
 0x1a6   : > { %2447 = vmatmul.mubr.bf16.vlgmr.msra.gmra.mrb[12].mxu0 %v1127_v28 }
 0x1a7   : > { %2457 = vmatpush3.bf16.xpose.msra.mxu0 %v3278_v29  ;;  %2458 = vmatprep.mubr.msk.bf16.mxu0 %vm2829_vm0, %v2828_v15 }
 0x1a8   : > { %2453 = vmatmul.mubr.bf16.vlgmr.msra.gmra.mrb[12].mxu1 %v1173_v30  ;;  %2468 = vmatprep.subr.bf16.mxu0 %v2828_v15 }
 0x1a9   : > { %2463 = vmatpush3.bf16.xpose.msra.mxu1 %v3284_v31  ;;  %2464 = vmatprep.mubr.msk.bf16.mxu1 %vm2829_vm0, %v2828_v15 }
 0x1aa   : > { %2474 = vmatprep.subr.bf16.mxu1 %v2828_v15 }
 0x1ae   : > { %2459 = vmatmul.mubr.bf16.vlgmr.msra.gmra.mrb[16].mxu0 %v1219_v35 }
 0x1af   : > { %2470 = vmatprep.mubr.msk.bf16.mxu0 %vm2829_vm0, %v2828_v15 }
 0x1b0   : > { %2465 = vmatmul.mubr.bf16.vlgmr.msra.gmra.mrb[16].mxu1 %v1265_v36 }
 0x1b1   : > { %2476 = vmatprep.mubr.msk.bf16.mxu1 %vm2829_vm0, %v2828_v15 }
 0x269   : > { %v979_v37 = vpop.f32.mrb[4].mxu0 }
 0x26a   : > { %v2424_v38 = vpop.f32.mrb[5].mxu0  ;;  %v1308_v39 = vsel %vm1307_vm1, %v979_v37, -inf }
 0x26b   : > { %1309 = vmax.xlane.f32.xlu0 %v1308_v39  ;;  %v982_v40 = vpop.f32.mrb[6].mxu0  ;;  %v1025_v41 = vpop.f32.mrb[4].mxu1 }
 0x26c   : > { %v2425_v42 = vpop.f32.mrb[7].mxu0  ;;  %v2430_v43 = vpop.f32.mrb[5].mxu1  ;;  %v1311_v46 = vsel %vm1307_vm1, %v1025_v41, -inf }
 0x26d   : > { %v1028_v44 = vpop.f32.mrb[6].mxu1 }
 0x26e   : > { %v2431_v45 = vpop.f32.mrb[7].mxu1 }
 0x26f   : > { %1312 = vmax.xlane.f32.xlu0 %v1311_v46 }
 0x271   : > { %v1071_v47 = vpop.f32.mrb[8].mxu0 }
 0x272   : > { %v2436_v48 = vpop.f32.mrb[9].mxu0  ;;  %v1314_v49 = vsel %vm1307_vm1, %v1071_v47, -inf }
 0x273   : > { %1315 = vmax.xlane.f32.xlu1 %v1314_v49  ;;  %v1074_v50 = vpop.f32.mrb[10].mxu0  ;;  %v1117_v51 = vpop.f32.mrb[8].mxu1 }
 0x274   : > { %v2437_v52 = vpop.f32.mrb[11].mxu0  ;;  %v2442_v53 = vpop.f32.mrb[9].mxu1  ;;  %v1317_v56 = vsel %vm1307_vm1, %v1117_v51, -inf }
 0x275   : > { %v1120_v54 = vpop.f32.mrb[10].mxu1 }
 0x276   : > { %v2443_v55 = vpop.f32.mrb[11].mxu1 }
 0x277   : > { %1318 = vmax.xlane.f32.xlu1 %v1317_v56 }
 0x279   : > { %v1163_v57 = vpop.f32.mrb[12].mxu0 }
 0x27a   : > { %v2448_v58 = vpop.f32.mrb[13].mxu0  ;;  %v1320_v59 = vsel %vm1307_vm1, %v1163_v57, -inf }
 0x27b   : > { %1321 = vmax.xlane.f32.xlu0 %v1320_v59  ;;  %v1166_v61 = vpop.f32.mrb[14].mxu0  ;;  %v1209_v62 = vpop.f32.mrb[12].mxu1 }
 0x27c   : > { %v2449_v63 = vpop.f32.mrb[15].mxu0  ;;  %v2454_v0 = vpop.f32.mrb[13].mxu1  ;;  %v1323_v1 = vsel %vm1307_vm1, %v1209_v62, -inf }
 0x27d   : > { %1324 = vmax.xlane.f32.xlu1 %v1323_v1  ;;  %v1212_v2 = vpop.f32.mrb[14].mxu1 }
 0x27e   : > { %v2455_v3 = vpop.f32.mrb[15].mxu1 }
 0x27f   : > { %v1410_v3 = vsel %vm1408_vm2, %v3197_v13, 0 }
 0x280   : > { %2469 = vmatpush3.bf16.msra.mxu0 %v1410_v3  ;;  %v2684_v3 = vld [vmem:[%s3508_s9 + $0x8] sm:$0xff]  }
 0x281   : > { %v1255_v4 = vpop.f32.mrb[16].mxu0  ;;  %2480 = vmatprep.subr.bf16.mxu0 %v2828_v15 }
 0x282   : > { %v2460_v5 = vpop.f32.mrb[17].mxu0  ;;  %v1326_v7 = vsel %vm1307_vm1, %v1255_v4, -inf }
 0x283   : > { %1327 = vmax.xlane.f32.xlu0 %v1326_v7  ;;  %v1258_v8 = vpop.f32.mrb[18].mxu0  ;;  %v1301_v10 = vpop.f32.mrb[16].mxu1 }
 0x284   : > { %v2461_v11 = vpop.f32.mrb[19].mxu0  ;;  %v2466_v12 = vpop.f32.mrb[17].mxu1  ;;  %v1329_v16 = vsel %vm1307_vm1, %v1301_v10, -inf }
 0x285   : > { %1330 = vmax.xlane.f32.xlu1 %v1329_v16  ;;  %v1304_v19 = vpop.f32.mrb[18].mxu1  ;;  %v1502_v16 = vsel %vm1408_vm2, %v3238_v6, 0 }
 0x286   : > { %v2467_v22 = vpop.f32.mrb[19].mxu1 }
 0x2f8   : > { %v1310_v24 = vpop.xlane.xlu0 %1309 }
 0x2f9   : > { %v1332_v25 = vsub.f32 %v979_v37, %v1310_v24 }
 0x2fb   : > { %v1340_v26 = vmul.f32 1.442695, %v1332_v25 }
 0x2fc   : > { %v1313_v27 = vpop.xlane.xlu0 %1312 }
 0x2fd   : > { %2713 = vpow2.f32 %v1340_v26  ;;  %v1333_v28 = vsub.f32 %v1025_v41, %v1313_v27  ;;  %v1548_v26 = vsel %vm1408_vm2, %v3244_v9, 0 }
 0x2ff   : > { %v1342_v30 = vmul.f32 1.442695, %v1333_v28 }
 0x300   : > { %v1316_v32 = vpop.xlane.xlu1 %1315 }
 0x301   : > { %2715 = vpow2.f32 %v1342_v30  ;;  %v1334_v33 = vsub.f32 %v1071_v47, %v1316_v32  ;;  %v1594_v30 = vsel %vm1408_vm2, %v3258_v21, 0 }
 0x303   : > { %v1344_v34 = vmul.f32 1.442695, %v1334_v33 }
 0x304   : > { %v1319_v35 = vpop.xlane.xlu1 %1318 }
 0x305   : > { %2717 = vpow2.f32 %v1344_v34  ;;  %v1335_v36 = vsub.f32 %v1117_v51, %v1319_v35 }
 0x307   : > { %v2714_v38 = vpop.eup %2713  ;;  %v1346_v39 = vmul.f32 1.442695, %v1335_v36  ;;  %v1640_v36 = vsel %vm1408_vm2, %v3264_v23, 0 }
 0x308   : > { %v1322_v40 = vpop.xlane.xlu0 %1321  ;;  %v1356_v42 = vsel %vm1307_vm1, %v2714_v38, 0.0 }
 0x309   : > { %2719 = vpow2.f32 %v1346_v39  ;;  %v1336_v43 = vsub.f32 %v1163_v57, %v1322_v40  ;;  %1357 = vadd.xlane.f32.xlu0 %v1356_v42 }
 0x30a   : > { %v1325_v37 = vpop.xlane.xlu1 %1324 }
 0x30b   : > { %v2716_v44 = vpop.eup %2715  ;;  %v1348_v45 = vmul.f32 1.442695, %v1336_v43  ;;  %v1337_v41 = vsub.f32 %v1209_v62, %v1325_v37  ;;  %v1686_v43 = vsel %vm1408_vm2, %v3278_v29, 0  ;;  %v1732_v37 = vsel %vm1408_vm2, %v3284_v31, 0  ;;  %v2659_v31 = vld [vmem:[%s3506_s7 + $0x4] ss:$8 sps:$4 sm:$0xff]  }
 0x30c   : > { %v1359_v46 = vsel %vm1307_vm1, %v2716_v44, 0.0 }
 0x30d   : > { %2721 = vpow2.f32 %v1348_v45  ;;  %v1350_v47 = vmul.f32 1.442695, %v1337_v41  ;;  %1360 = vadd.xlane.f32.xlu1 %v1359_v46 }
 0x30f   : > { %v2718_v48 = vpop.eup %2717  ;;  %2723 = vpow2.f32 %v1350_v47 }
 0x310   : > { %v1328_v49 = vpop.xlane.xlu0 %1327  ;;  %v1362_v50 = vsel %vm1307_vm1, %v2718_v48, 0.0 }
 0x311   : > { %v1338_v51 = vsub.f32 %v1255_v4, %v1328_v49  ;;  %1363 = vadd.xlane.f32.xlu0 %v1362_v50  ;;  %v1456_v4 = vsel %vm1408_vm2, %v3202_v14, 0  ;;  %v2660_v49 = vld [vmem:[%s3506_s7 + $0x10] ss:$8 sps:$4 sm:$0xff]   ;;  %v2665_v50 = vld [vmem:[%s3506_s7 + $0x24] ss:$8 sps:$4 sm:$0xff]  }
 0x312   : > { %v1331_v52 = vpop.xlane.xlu1 %1330  ;;  %2475 = vmatpush3.bf16.msra.mxu1 %v1456_v4  ;;  %v2685_v4 = vld [vmem:[%s3508_s9 + $0x50] sm:$0xff]  }
 0x313   : > { %v2720_v53 = vpop.eup %2719  ;;  %v1352_v54 = vmul.f32 1.442695, %v1338_v51  ;;  %v1339_v55 = vsub.f32 %v1301_v10, %v1331_v52  ;;  %2486 = vmatprep.subr.bf16.mxu1 %v2828_v15  ;;  %v2663_v51 = vld [vmem:[%s3506_s7 + $0x20] ss:$8 sps:$4 sm:$0xff]   ;;  %v2668_v52 = vld [vmem:[%s3506_s7 + $0x34] ss:$8 sps:$4 sm:$0xff]  }
 0x314   : > { %v1365_v56 = vsel %vm1307_vm1, %v2720_v53, 0.0 }
 0x315   : > { %2725 = vpow2.f32 %v1352_v54  ;;  %v1354_v57 = vmul.f32 1.442695, %v1339_v55  ;;  %1366 = vadd.xlane.f32.xlu1 %v1365_v56  ;;  %v2671_v54 = vld [vmem:[%s3506_s7 + $0x44] ss:$8 sps:$4 sm:$0xff]   ;;  %v2669_v55 = vld [vmem:[%s3506_s7 + $0x40] ss:$8 sps:$4 sm:$0xff]  }
 0x316   : > { %v2674_v56 = vld [vmem:[%s3506_s7 + $0x54] ss:$8 sps:$4 sm:$0xff]  }
 0x317   : > { %v3312_v58 = vpop.eup %2721  ;;  %2727 = vpow2.f32 %v1354_v57  ;;  %v2672_v57 = vld [vmem:[%s3506_s7 + $0x50] ss:$8 sps:$4 sm:$0xff]  }
 0x318   : > { %v1368_v59 = vsel %vm1307_vm1, %v3312_v58, 0.0 }
 0x319   : > { %v3316_v61 = vpop.eup %2723  ;;  %1369 = vadd.xlane.f32.xlu0 %v1368_v59  ;;  %v2675_v59 = vld [vmem:[%s3506_s7 + $0x60] ss:$8 sps:$4 sm:$0xff]  }
 0x31a   : > { %v1371_v62 = vsel %vm1307_vm1, %v3316_v61, 0.0 }
 0x31b   : > { %1372 = vadd.xlane.f32.xlu1 %v1371_v62  ;;  %v2678_v62 = vld [vmem:[%s3506_s7 + $0x70] ss:$8 sps:$4 sm:$0xff]  }
 0x31f   : > { %v3320_v63 = vpop.eup %2725 }
 0x320   : > { %v1374_v0 = vsel %vm1307_vm1, %v3320_v63, 0.0 }
 0x321   : > { %v3324_v1 = vpop.eup %2727  ;;  %1375 = vadd.xlane.f32.xlu0 %v1374_v0  ;;  %v2681_v0 = vld [vmem:[%s3508_s9 + $0x40] sm:$0xff]  }
 0x322   : > { %v1377_v2 = vsel %vm1307_vm1, %v3324_v1, 0.0 }
 0x323   : > { %1378 = vadd.xlane.f32.xlu1 %v1377_v2  ;;  %v2683_v2 = vld [vmem:[%s3508_s9 + $0x48] sm:$0xff]  }
 0x396   : > { %v1358_v5 = vpop.xlane.xlu0 %1357 }
 0x397   : > { %2729 = vrcp.f32 %v1358_v5  ;;  %v2686_v5 = vld [vmem:[%s3508_s9 + $0x10] sm:$0xff]  }
 0x39a   : > { %v1361_v7 = vpop.xlane.xlu1 %1360 }
 0x39b   : > { %2731 = vrcp.f32 %v1361_v7  ;;  %v2687_v7 = vld [vmem:[%s3508_s9 + $0x58] sm:$0xff]  }
 0x39e   : > { %v1364_v8 = vpop.xlane.xlu0 %1363 }
 0x39f   : > { %2733 = vrcp.f32 %v1364_v8  ;;  %v2688_v8 = vld [vmem:[%s3508_s9 + $0x18] sm:$0xff]  }
 0x3a1   : > { %v2730_v10 = vpop.eup %2729 }
 0x3a2   : > { %v1388_v11 = vmul.f32 %v2730_v10, %v2714_v38  ;;  %v1367_v12 = vpop.xlane.xlu1 %1366  ;;  %v2689_v10 = vld [vmem:[%s3508_s9 + $0x60] sm:$0xff]  }
 0x3a3   : > { %2735 = vrcp.f32 %v1367_v12  ;;  %v2691_v12 = vld [vmem:[%s3508_s9 + $0x68] sm:$0xff]  }
 0x3a4   : > { %v1396_v13 = vpack.c.bf16 %v1388_v11, %v1388_v11  ;;  %v2690_v11 = vld [vmem:[%s3508_s9 + $0x20] sm:$0xff]  }
 0x3a5   : > { %v2732_v19 = vpop.eup %2731 }
 0x3a6   : > { %v1389_v14 = vmul.f32 %v2732_v19, %v2716_v44  ;;  %2471 = vmatmul.mubr.msk.bf16.vlgmr.msra.gmra.mrb[20].mxu0 %vm1404_vm3, %v1396_v13  ;;  %v1370_v22 = vpop.xlane.xlu0 %1369  ;;  %v2692_v13 = vld [vmem:[%s3508_s9 + $0x28] sm:$0xff]  }
 0x3a7   : > { %2737 = vrcp.f32 %v1370_v22  ;;  %2481 = vmatpush3.bf16.msra.mxu0 %v1502_v16  ;;  %2482 = vmatprep.mubr.msk.bf16.mxu0 %vm2829_vm0, %v2828_v15  ;;  %v2693_v16 = vld [vmem:[%s3508_s9 + $0x70] sm:$0xff]  }
 0x3a8   : > { %v1373_v24 = vpop.xlane.xlu1 %1372  ;;  %v1397_v25 = vpack.c.bf16 %v1389_v14, %v1389_v14  ;;  %2492 = vmatprep.subr.bf16.mxu0 %v2828_v15 }
 0x3a9   : > { %v2734_v27 = vpop.eup %2733  ;;  %2739 = vrcp.f32 %v1373_v24 }
 0x3aa   : > { %v1390_v6 = vmul.f32 %v2734_v27, %v2718_v48  ;;  %2477 = vmatmul.mubr.msk.bf16.vlgmr.msra.gmra.mrb[20].mxu1 %vm1404_vm3, %v1397_v25  ;;  %v2657_v48 = vld [vmem:[%s3506_s7] ss:$8 sps:$4 sm:$0xff]  }
 0x3ab   : > { %2487 = vmatpush3.bf16.msra.mxu1 %v1548_v26  ;;  %2488 = vmatprep.mubr.msk.bf16.mxu1 %vm2829_vm0, %v2828_v15  ;;  %v1783_v26 = vrot.slane %v3228_v60, 1 }
 0x3ac   : > { %v1398_v28 = vpack.c.bf16 %v1390_v6, %v1390_v6  ;;  %2498 = vmatprep.subr.bf16.mxu1 %v2828_v15 }
 0x3ad   : > { %v2736_v32 = vpop.eup %2735 }
 0x3ae   : > { %v1391_v33 = vmul.f32 %v2736_v32, %v2720_v53  ;;  %2483 = vmatmul.mubr.msk.bf16.vlgmr.msra.gmra.mrb[24].mxu0 %vm1404_vm3, %v1398_v28  ;;  %v1376_v9 = vpop.xlane.xlu0 %1375  ;;  %v2666_v53 = vld [vmem:[%s3506_s7 + $0x30] ss:$8 sps:$4 sm:$0xff]  }
 0x3af   : > { %2741 = vrcp.f32 %v1376_v9  ;;  %2493 = vmatpush3.bf16.msra.mxu0 %v1594_v30  ;;  %2494 = vmatprep.mubr.msk.bf16.mxu0 %vm2829_vm0, %v2828_v15 }
 0x3b0   : > { %v1379_v34 = vpop.xlane.xlu1 %1378  ;;  %v1399_v35 = vpack.c.bf16 %v1391_v33, %v1391_v33  ;;  %2504 = vmatprep.subr.bf16.mxu0 %v2828_v15 }
 0x3b1   : > { %v2738_v21 = vpop.eup %2737  ;;  %2743 = vrcp.f32 %v1379_v34  ;;  %v1784_v34 = vrot.slane %v3228_v60, 2 }
 0x3b2   : > { %v1392_v38 = vmul.f32 %v2738_v21, %v3312_v58  ;;  %2489 = vmatmul.mubr.msk.bf16.vlgmr.msra.gmra.mrb[24].mxu1 %vm1404_vm3, %v1399_v35  ;;  %v2677_v58 = vld [vmem:[%s3506_s7 + $0x64] ss:$8 sps:$4 sm:$0xff]  }
 0x3b3   : > { %v2740_v39 = vpop.eup %2739  ;;  %2499 = vmatpush3.bf16.msra.mxu1 %v1640_v36  ;;  %2500 = vmatprep.mubr.msk.bf16.mxu1 %vm2829_vm0, %v2828_v15 }
 0x3b4   : > { %v1393_v40 = vmul.f32 %v2740_v39, %v3316_v61  ;;  %v1400_v42 = vpack.c.bf16 %v1392_v38, %v1392_v38  ;;  %2510 = vmatprep.subr.bf16.mxu1 %v2828_v15  ;;  %v2680_v61 = vld [vmem:[%s3506_s7 + $0x74] ss:$8 sps:$4 sm:$0xff]  }
 0x3b6   : > { %2495 = vmatmul.mubr.msk.bf16.vlgmr.msra.gmra.mrb[28].mxu0 %vm1404_vm3, %v1400_v42  ;;  %v1401_v23 = vpack.c.bf16 %v1393_v40, %v1393_v40 }
 0x3b7   : > { %2505 = vmatpush3.bf16.msra.mxu0 %v1686_v43  ;;  %2506 = vmatprep.mubr.msk.bf16.mxu0 %vm2829_vm0, %v2828_v15 }
 0x3b8   : > { %1961 = vmatprep.subr.bf16.mxu0 %v2659_v31 }
 0x3b9   : > { %v2742_v44 = vpop.eup %2741 }
 0x3ba   : > { %v1394_v45 = vmul.f32 %v2742_v44, %v3320_v63  ;;  %2501 = vmatmul.mubr.msk.bf16.vlgmr.msra.gmra.mrb[28].mxu1 %vm1404_vm3, %v1401_v23  ;;  %v2831_v63 = vmov 0  }
 0x3bb   : > { %v2744_v41 = vpop.eup %2743  ;;  %2511 = vmatpush3.bf16.msra.mxu1 %v1732_v37  ;;  %2512 = vmatprep.mubr.msk.bf16.mxu1 %vm2829_vm0, %v2828_v15  ;;  %v2662_v15 = vld [vmem:[%s3506_s7 + $0x14] ss:$8 sps:$4 sm:$0xff]   ;;  %v1785_v37 = vrot.slane %v3228_v60, 3 }
 0x3bc   : > { %v1402_v29 = vpack.c.bf16 %v1394_v45, %v1394_v45  ;;  %v1395_v46 = vmul.f32 %v2744_v41, %v3324_v1  ;;  %v2682_v1 = vld [vmem:[%s3508_s9] sm:$0xff]   ;;  %2398 = vmatprep.subr.bf16.mxu1 %v2681_v0 }
 0x3be   : > { %2507 = vmatmul.mubr.msk.bf16.vlgmr.msra.gmra.mrb[32].mxu0 %vm1404_vm3, %v1402_v29  ;;  %v1403_v47 = vpack.c.bf16 %v1395_v46, %v1395_v46 }
 0x3bf   : > { %1962 = vmatpush1.bf16.msra.mxu0 %v2657_v48  ;;  %1993 = vmatprep.mubr.bf16.mxu0 %v2831_v63 }
 0x3c0   : > { %1963 = vmatprep.subr.bf16.mxu0 %v2662_v15 }
 0x3c2   : > { %2513 = vmatmul.mubr.msk.bf16.vlgmr.msra.gmra.mrb[32].mxu1 %vm1404_vm3, %v1403_v47 }
 0x3c3   : > { %1964 = vmatpush1.bf16.msra.mxu0 %v2660_v49  ;;  %2399 = vmatpush3.bf16.msra.mxu1 %v2682_v1  ;;  %v1786_v49 = vrot.slane %v3228_v60, 4 }
 0x3c4   : > { %1965 = vmatprep.subr.bf16.mxu0 %v2665_v50  ;;  %2400 = vmatprep.subr.bf16.mxu1 %v2683_v2 }
 0x3c7   : > { %1966 = vmatpush1.bf16.msra.mxu0 %v2663_v51  ;;  %2401 = vmatpush3.bf16.msra.mxu1 %v2684_v3 }
 0x3c8   : > { %1967 = vmatprep.subr.bf16.mxu0 %v2668_v52  ;;  %2402 = vmatprep.subr.bf16.mxu1 %v2685_v4 }
 0x3cb   : > { %1968 = vmatpush1.bf16.msra.mxu0 %v2666_v53  ;;  %2403 = vmatpush3.bf16.msra.mxu1 %v2686_v5 }
 0x3cc   : > { %1969 = vmatprep.subr.bf16.mxu0 %v2671_v54  ;;  %2404 = vmatprep.subr.bf16.mxu1 %v2687_v7  ;;  %v1788_v7 = vrot.slane %v3228_v60, 6 }
 0x3cf   : > { %1970 = vmatpush1.bf16.msra.mxu0 %v2669_v55  ;;  %2405 = vmatpush3.bf16.msra.mxu1 %v2688_v8 }
 0x3d0   : > { %1971 = vmatprep.subr.bf16.mxu0 %v2674_v56  ;;  %2406 = vmatprep.subr.bf16.mxu1 %v2689_v10 }
 0x3d3   : > { %1972 = vmatpush1.bf16.msra.mxu0 %v2672_v57  ;;  %2407 = vmatpush3.bf16.msra.mxu1 %v2690_v11 }
 0x3d4   : > { %1973 = vmatprep.subr.bf16.mxu0 %v2677_v58  ;;  %2408 = vmatprep.subr.bf16.mxu1 %v2691_v12 }
 0x3d7   : > { %1974 = vmatpush1.bf16.msra.mxu0 %v2675_v59  ;;  %2409 = vmatpush3.bf16.msra.mxu1 %v2692_v13  ;;  %v1787_v59 = vrot.slane %v3228_v60, 5 }
 0x3d8   : > { %1975 = vmatprep.subr.bf16.mxu0 %v2680_v61  ;;  %2410 = vmatprep.subr.bf16.mxu1 %v2693_v16 }
 0x3db   : > { %1976 = vmatpush1.bf16.msra.mxu0 %v2678_v62 }
 0x479   : > { %v1446_v19 = vpop.f32.mrb[20].mxu0 }
 0x47a   : > { %v2472_v14 = vpop.f32.mrb[21].mxu0  ;;  %v1798_v24 = vadd.f32 %v1446_v19, %v3228_v60 }
 0x47b   : > { %v1449_v22 = vpop.f32.mrb[22].mxu0 }
 0x47c   : > { %v2473_v25 = vpop.f32.mrb[23].mxu0  ;;  %v1806_v32 = vpack.c.bf16 %v1798_v24, %v1798_v24  ;;  %v1789_v24 = vrot.slane %v3228_v60, 7  ;;  %v2694_v60 = vld [vmem:[%s3508_s9 + $0x30] sm:$0xff]  }
 0x47d   : > { %v1492_v27 = vpop.f32.mrb[20].mxu1  ;;  %2411 = vmatpush3.bf16.msra.mxu1 %v2694_v60 }
 0x47e   : > { %v1799_v6 = vadd.f32 %v1783_v26, %v1492_v27  ;;  %v2478_v28 = vpop.f32.mrb[21].mxu1  ;;  %v1850_v40 = vunpack.c.l.b16 %v1806_v32 }
 0x47f   : > { %v1495_v30 = vpop.f32.mrb[22].mxu1 }
 0x480   : > { %v1807_v33 = vpack.c.bf16 %v1799_v6, %v1799_v6  ;;  %v2479_v9 = vpop.f32.mrb[23].mxu1 }
 0x481   : > { %v1538_v35 = vpop.f32.mrb[24].mxu0 }
 0x482   : > { %v1851_v36 = vunpack.c.l.b16 %v1807_v33  ;;  %v1800_v21 = vadd.f32 %v1784_v34, %v1538_v35  ;;  %v2484_v38 = vpop.f32.mrb[25].mxu0 }
 0x483   : > { %v1541_v39 = vpop.f32.mrb[26].mxu0 }
 0x484   : > { %v1858_v42 = vrot.slane %v1851_v36, 7  ;;  %v1808_v43 = vpack.c.bf16 %v1800_v21, %v1800_v21  ;;  %v2485_v23 = vpop.f32.mrb[27].mxu0  ;;  %v2695_v39 = vld [vmem:[%s3508_s9 + $0x78] sm:$0xff]  }
 0x485   : > { %v1584_v44 = vpop.f32.mrb[24].mxu1  ;;  %2412 = vmatprep.subr.bf16.mxu1 %v2695_v39 }
 0x486   : > { %v1860_v45 = vsel %vm1859_vm4, %v1858_v42, %v1850_v40  ;;  %v1852_v41 = vunpack.c.l.b16 %v1808_v43  ;;  %v1801_v29 = vadd.f32 %v1785_v37, %v1584_v44  ;;  %v2490_v46 = vpop.f32.mrb[25].mxu1  ;;  %v2696_v40 = vld [vmem:[%s3508_s9 + $0x38] sm:$0xff]   ;;  %v1830_v42 = vld [vmem:[%s3507_s8] sm:$0x3] }
 0x487   : > { %v1587_v47 = vpop.f32.mrb[26].mxu1  ;;  %2413 = vmatpush3.bf16.msra.mxu1 %v2696_v40  ;;  %v1835_v43 = vrot.slane %v1830_v42, %v3217_v18  ;;  %v1839_v23 = vrot.slane %v1830_v42, %v455_v20 }
 0x488   : > { %v1861_v31 = vrot.slane %v1852_v41, 6  ;;  %v1809_v48 = vpack.c.bf16 %v1801_v29, %v1801_v29  ;;  %v2491_v15 = vpop.f32.mrb[27].mxu1 }
 0x489   : > { %v1630_v50 = vpop.f32.mrb[28].mxu0 }
 0x48a   : > { %v1863_v51 = vsel %vm1862_vm5, %v1861_v31, %v1860_v45  ;;  %v1853_v52 = vunpack.c.l.b16 %v1809_v48  ;;  %v1802_v53 = vadd.f32 %v1786_v49, %v1630_v50  ;;  %v2496_v54 = vpop.f32.mrb[29].mxu0 }
 0x48b   : > { %v1633_v55 = vpop.f32.mrb[30].mxu0 }
 0x48c   : > { %v1864_v56 = vrot.slane %v1853_v52, 5  ;;  %v1810_v57 = vpack.c.bf16 %v1802_v53, %v1802_v53  ;;  %v2497_v58 = vpop.f32.mrb[31].mxu0 }
 0x48d   : > { %v1676_v61 = vpop.f32.mrb[28].mxu1 }
 0x48e   : > { %v1866_v62 = vsel %vm1865_vm6, %v1864_v56, %v1863_v51  ;;  %v1854_v63 = vunpack.c.l.b16 %v1810_v57  ;;  %v1803_v0 = vadd.f32 %v1787_v59, %v1676_v61  ;;  %v2502_v1 = vpop.f32.mrb[29].mxu1 }
 0x48f   : > { %v1679_v2 = vpop.f32.mrb[30].mxu1 }
 0x490   : > { %v1867_v3 = vrot.slane %v1854_v63, 4  ;;  %v1811_v4 = vpack.c.bf16 %v1803_v0, %v1803_v0  ;;  %v2503_v5 = vpop.f32.mrb[31].mxu1 }
 0x491   : > { %v1722_v8 = vpop.f32.mrb[32].mxu0 }
 0x492   : > { %v1869_v10 = vsel %vm1868_vm7, %v1867_v3, %v1866_v62  ;;  %v1855_v11 = vunpack.c.l.b16 %v1811_v4  ;;  %v1804_v12 = vadd.f32 %v1788_v7, %v1722_v8  ;;  %v2508_v13 = vpop.f32.mrb[33].mxu0 }
 0x493   : > { %v1725_v16 = vpop.f32.mrb[34].mxu0 }
 0x494   : > { %v1870_v19 = vrot.slane %v1855_v11, 3  ;;  %v1812_v14 = vpack.c.bf16 %v1804_v12, %v1804_v12  ;;  %v2509_v22 = vpop.f32.mrb[35].mxu0 }
 0x495   : > { %v1768_v25 = vpop.f32.mrb[32].mxu1 }
 0x496   : > { %v1872_v26 = vsel %vm1871_vm8, %v1870_v19, %v1869_v10  ;;  %v1856_v27 = vunpack.c.l.b16 %v1812_v14  ;;  %v1805_v6 = vadd.f32 %v1789_v24, %v1768_v25  ;;  %v2514_v28 = vpop.f32.mrb[33].mxu1 }
 0x497   : > { %v1771_v30 = vpop.f32.mrb[34].mxu1 }
 0x498   : > { %v1873_v32 = vrot.slane %v1856_v27, 2  ;;  %v1813_v33 = vpack.c.bf16 %v1805_v6, %v1805_v6  ;;  %v2515_v9 = vpop.f32.mrb[35].mxu1 }
 0x49a   : > { %v1875_v34 = vsel %vm1874_vm9, %v1873_v32, %v1872_v26  ;;  %v1857_v35 = vunpack.c.l.b16 %v1813_v33 }
 0x49c   : > { %v1876_v36 = vrot.slane %v1857_v35, 1 }
 0x49e   : > { %v1878_v21 = vsel %vm1877_vm10, %v1876_v36, %v1875_v34 }
 0x49f   : > { %v1879_v38 = vpack.c.b16 %v1878_v21, %v1878_v21 }
 0x4a1   : > { %1994 = vmatmul.mubr.bf16.vlgmr.msra.gmra.mrb[36].mxu0 %v1879_v38 }
 0x574   : > { %v1995_v37 = vpop.f32.mrb[36].mxu0 }
 0x575   : > { %v1996_v44 = vadd.f32 %v1995_v37, %v1835_v43  ;;  %v1997_v45 = vpop.f32.mrb[37].mxu0 }
 0x576   : > { %v1998_v41 = vadd.f32 %v1997_v45, %v1839_v23  ;;  %v1999_v29 = vpop.f32.mrb[38].mxu0 }
 0x577   : > { %2002 = vst [vmem:[%s2987_s16] sm:$0xff] %v1996_v44  ;;  %v2000_v46 = vpop.f32.mrb[39].mxu0  ;;  %v2004_v31 = vpack.c.bf16 %v1996_v44, %v1996_v44 }
 0x578   : > { %2003 = vst [vmem:[%s2987_s16 + $0x8] sm:$0xff] %v1998_v41  ;;  %v2005_v47 = vpack.c.bf16 %v1998_v41, %v1998_v41 }
 0x57a   : > { %2166 = vmatprep.mubr.bf16.mxu1 %v2005_v47 }
 0x57b   : > { %2167 = vmatmul.mubr.bf16.vlgmr.msra.gmra.mrb[36].mxu1 %v2004_v31 }
 0x64e   : > { %v2414_v48 = vpop.f32.mrb[36].mxu1 }
 0x64f   : > { %v2415_v15 = vpop.f32.mrb[37].mxu1 }
 0x650   : > { %v2416_v49 = vadd.f32 %v2415_v15, %v2414_v48  ;;  %v2417_v50 = vpop.f32.mrb[38].mxu1 }
 0x651   : > { %v2418_v18 = vpop.f32.mrb[39].mxu1 }
 0x652   : > { %2174 = vst [vmem:[#allocation4] sm:$0xff] %v2416_v49 }
 0x653 PF: > { %p26_p1 = scmp.ge.s32.totalorder %s2912_s22, 7   ;;  %s3514_s18 = smov %s2815_s19 }
 0x654   : > { %s3515_s19 = smov %s2819_s0  ;;  %s3516_s0 = smov %s2922_s25 }
 0x655   : > { %s3517_s20 = smov %s2912_s22  ;;  %28 = sbr.rel (!%p26_p1) target bundleno = 18 (0x12), region = 100 }
 0x65c   :  { %2196 = vsyncpa [#allocation8], 1 }
 0x65d   :  { %2198 = vsyncpa [#allocation8 + $0x1], 1 }

</bundles_post_ra>
